<compile_context>
chip_gen: v5e
topology: v5e:2x2
jax: 0.10.0
libtpu: 0.0.40
codegen_flags: <defaults>
</compile_context>

<pallas_src>
import functools
import math

import jax
import jax.numpy as jnp
from jax.experimental import pallas as pl
from jax.experimental.pallas import tpu as pltpu

# ---- small roberta-like config (roberta-large scaled down) ----
VOCAB = 100
MAX_POS = 40
PAD_IDX = 1            # roberta padding_idx
HIDDEN = 32
NUM_HEADS = 2
HEAD_DIM = HIDDEN // NUM_HEADS
INTERMEDIATE = 64
NUM_LAYERS = 2
LN_EPS = 1e-5
NEG_INF = -1e9


# ----------------------------- in-kernel helpers -----------------------------
def _layernorm(x, g, b):
    mu = jnp.mean(x, axis=-1, keepdims=True)
    var = jnp.mean(jnp.square(x - mu), axis=-1, keepdims=True)
    return (x - mu) * jax.lax.rsqrt(var + LN_EPS) * g + b


def _gelu(x):
    # TODO(synk): HF roberta uses exact erf-GELU; tanh approximation used here.
    c = math.sqrt(2.0 / math.pi)
    return 0.5 * x * (1.0 + jnp.tanh(c * (x + 0.044715 * x * x * x)))


# ----------------------------- fused encoder kernel --------------------------
def encoder_kernel(x_ref, mask_ref, embln_ref,
                   wqkv_ref, bqkv_ref, wo_ref, wi_ref, bi_ref, wf_ref, small_ref,
                   o_ref):
    add_mask = mask_ref[0]                                  # (1, S) additive mask
    embln = embln_ref[...]                                  # (2, H) = [gamma; beta]
    x = _layernorm(x_ref[0], embln[0:1, :], embln[1:2, :])  # (S, H) f32

    scale = 1.0 / math.sqrt(HEAD_DIM)

    for l in range(NUM_LAYERS):                             # unrolled at trace time
        wqkv = wqkv_ref[l]                                  # (H, 3H)  bf16
        wo = wo_ref[l]                                      # (H, H)   bf16
        wi = wi_ref[l]                                      # (H, I)   bf16
        wf = wf_ref[l]                                      # (I, H)   bf16
        bqkv = bqkv_ref[l]                                  # (1, 3H)  f32
        bi = bi_ref[l]                                      # (1, I)   f32
        small = small_ref[l]                                # (6, H)   f32
        bo = small[0:1, :]
        g1 = small[1:2, :]
        b1 = small[2:3, :]
        bff = small[3:4, :]
        g2 = small[4:5, :]
        b2 = small[5:6, :]

        # --- fused QKV projection: one MXU push (lane width 3H) ---
        xb = x.astype(jnp.bfloat16)
        qkv = jnp.dot(xb, wqkv, preferred_element_type=jnp.float32) + bqkv  # (S, 3H)

        # --- attention per head; contexts gathered into one (S, H) buffer ---
        ctx_heads = []
        for h in range(NUM_HEADS):                          # small, unrolled
            lo = h * HEAD_DIM
            qh = qkv[:, lo:lo + HEAD_DIM].astype(jnp.bfloat16)
            kh = qkv[:, HIDDEN + lo:HIDDEN + lo + HEAD_DIM].astype(jnp.bfloat16)
            vh = qkv[:, 2 * HIDDEN + lo:2 * HIDDEN + lo + HEAD_DIM].astype(jnp.bfloat16)
            # scores = qh @ kh^T (contract last dims, no explicit transpose)
            s = jax.lax.dot_general(qh, kh, (((1,), (1,)), ((), ())),
                                    preferred_element_type=jnp.float32)
            s = s * scale + add_mask                        # (S, S) broadcast of (1, S)
            s = s - jnp.max(s, axis=-1, keepdims=True)
            p = jnp.exp(s)
            p = p * pl.reciprocal(jnp.sum(p, axis=-1, keepdims=True), approx=True)
            ctx_heads.append(jnp.dot(p.astype(jnp.bfloat16), vh,
                                     preferred_element_type=jnp.float32))
        ctx = jnp.concatenate(ctx_heads, axis=-1)           # (S, H) f32

        # --- single output projection matmul over all heads ---
        attn = jnp.dot(ctx.astype(jnp.bfloat16), wo,
                       preferred_element_type=jnp.float32) + bo
        h1 = _layernorm(x + attn, g1, b1)

        # --- FFN ---
        ff = jnp.dot(h1.astype(jnp.bfloat16), wi,
                     preferred_element_type=jnp.float32) + bi
        ff = _gelu(ff)
        ff = jnp.dot(ff.astype(jnp.bfloat16), wf,
                     preferred_element_type=jnp.float32) + bff
        x = _layernorm(h1 + ff, g2, b2)

    o_ref[0] = x


# ----------------------------- wrapper ---------------------------------------
def _const_index_map(ndim):
    return functools.partial(lambda n, b: (0,) * n, ndim)


def run_encoder(emb, add_mask, params):
    """emb: (B, S, H) f32 embeddings (pre-LN), add_mask: (B, 1, S) additive mask."""
    B, S, H = emb.shape
    weight_args = [params["emb_ln"], params["wqkv"], params["bqkv"], params["wo"],
                   params["wi"], params["bi"], params["wf"], params["small"]]
    in_specs = [
        pl.BlockSpec((1, S, H), lambda i: (i, 0, 0)),
        pl.BlockSpec((1, 1, S), lambda i: (i, 0, 0)),
    ]
    for a in weight_args:
        in_specs.append(pl.BlockSpec(a.shape, _const_index_map(a.ndim)))
    return pl.pallas_call(
        encoder_kernel,
        out_shape=jax.ShapeDtypeStruct((B, S, H), jnp.float32),
        grid=(B,),
        in_specs=in_specs,
        out_specs=pl.BlockSpec((1, S, H), lambda i: (i, 0, 0)),
        compiler_params=pltpu.CompilerParams(dimension_semantics=("parallel",)),
    )(emb, add_mask, *weight_args)


# ----------------------------- params & forward -------------------------------
def init_params(key):
    keys = iter(jax.random.split(key, 6 * NUM_LAYERS + 4))

    def w(nin, nout):
        return 0.02 * jax.random.normal(next(keys), (nin, nout), jnp.float32)

    wqkv_l, bqkv_l, wo_l, wi_l, bi_l, wf_l, small_l = [], [], [], [], [], [], []
    for _ in range(NUM_LAYERS):
        wq, wk, wv = w(HIDDEN, HIDDEN), w(HIDDEN, HIDDEN), w(HIDDEN, HIDDEN)
        wqkv_l.append(jnp.concatenate([wq, wk, wv], axis=1))          # (H, 3H)
        bqkv_l.append(jnp.zeros((1, 3 * HIDDEN), jnp.float32))
        wo_l.append(w(HIDDEN, HIDDEN))
        wi_l.append(w(HIDDEN, INTERMEDIATE))
        bi_l.append(jnp.zeros((1, INTERMEDIATE), jnp.float32))
        wf_l.append(w(INTERMEDIATE, HIDDEN))
        # packed small params: [bo, ln1_g, ln1_b, ffn_out_b, ln2_g, ln2_b]
        small_l.append(jnp.stack([
            jnp.zeros((HIDDEN,), jnp.float32),
            jnp.ones((HIDDEN,), jnp.float32),
            jnp.zeros((HIDDEN,), jnp.float32),
            jnp.zeros((HIDDEN,), jnp.float32),
            jnp.ones((HIDDEN,), jnp.float32),
            jnp.zeros((HIDDEN,), jnp.float32),
        ], axis=0))                                                   # (6, H)

    params = {
        "word_emb": 0.02 * jax.random.normal(next(keys), (VOCAB, HIDDEN), jnp.float32),
        "pos_emb": 0.02 * jax.random.normal(next(keys), (MAX_POS, HIDDEN), jnp.float32),
        "type_emb": 0.02 * jax.random.normal(next(keys), (1, HIDDEN), jnp.float32),
        "emb_ln": jnp.stack([jnp.ones((HIDDEN,), jnp.float32),
                             jnp.zeros((HIDDEN,), jnp.float32)], axis=0),   # (2, H)
        # stacked per-layer weights; matmul weights stored as bf16 for the MXU
        "wqkv": jnp.stack(wqkv_l).astype(jnp.bfloat16),   # (L, H, 3H)
        "bqkv": jnp.stack(bqkv_l),                        # (L, 1, 3H)
        "wo": jnp.stack(wo_l).astype(jnp.bfloat16),       # (L, H, H)
        "wi": jnp.stack(wi_l).astype(jnp.bfloat16),       # (L, H, I)
        "bi": jnp.stack(bi_l),                            # (L, 1, I)
        "wf": jnp.stack(wf_l).astype(jnp.bfloat16),       # (L, I, H)
        "small": jnp.stack(small_l),                      # (L, 6, H)
    }
    return params


def plm_encoder_forward(params, input_ids, attention_mask):
    """Returns last_hidden_state of shape (B, S, HIDDEN)."""
    B, S = input_ids.shape
    mask_i = attention_mask.astype(jnp.int32)
    mask_f = attention_mask.astype(jnp.float32)

    # roberta position ids: cumsum over non-pad tokens, offset by padding_idx
    pos_ids = (jnp.cumsum(mask_i, axis=1) * mask_i + PAD_IDX).astype(jnp.int32)

    emb = (jnp.take(params["word_emb"], input_ids, axis=0)
           + jnp.take(params["pos_emb"], pos_ids, axis=0)
           + params["type_emb"][0])                           # token_type_ids == 0

    add_mask = ((1.0 - mask_f) * NEG_INF).reshape(B, 1, S).astype(jnp.float32)
    return run_encoder(emb.astype(jnp.float32), add_mask, params)


if __name__ == "__main__":
    key = jax.random.PRNGKey(0)
    pkey, ikey = jax.random.split(key)
    params = init_params(pkey)

    B, S = 2, 8
    input_ids = jax.random.randint(ikey, (B, S), 2, VOCAB, dtype=jnp.int32)
    attention_mask = jnp.ones((B, S), dtype=jnp.int32)
    attention_mask = attention_mask.at[1, 6:].set(0)          # second sequence padded
    input_ids = jnp.where(attention_mask == 1, input_ids, PAD_IDX)

    out = plm_encoder_forward(params, input_ids, attention_mask)
    out = jax.block_until_ready(out)
    assert out.shape == (B, S, HIDDEN) and out.dtype == jnp.float32
    assert bool(jnp.all(jnp.isfinite(out)))
    print("KERNEL_OK")
</pallas_src>

<mosaic_0001>
module attributes {stable_mosaic.version = 11 : i64} {
  func.func @encoder_kernel(%arg0: i32, %arg1: memref<1x8x32xf32, #tpu.memory_space<vmem>>, %arg2: memref<1x1x8xf32, #tpu.memory_space<vmem>>, %arg3: memref<2x32xf32, #tpu.memory_space<vmem>>, %arg4: memref<2x32x96xbf16, #tpu.memory_space<vmem>>, %arg5: memref<2x1x96xf32, #tpu.memory_space<vmem>>, %arg6: memref<2x32x32xbf16, #tpu.memory_space<vmem>>, %arg7: memref<2x32x64xbf16, #tpu.memory_space<vmem>>, %arg8: memref<2x1x64xf32, #tpu.memory_space<vmem>>, %arg9: memref<2x64x32xbf16, #tpu.memory_space<vmem>>, %arg10: memref<2x6x32xf32, #tpu.memory_space<vmem>>, %arg11: memref<1x8x32xf32, #tpu.memory_space<vmem>>) attributes {dimension_semantics = [#tpu.dimension_semantics<parallel>], iteration_bounds = array<i64: 2>, scalar_prefetch = 0 : i64, scratch_operands = 0 : i64, tpu.core_type = #tpu.core_type<tc>, window_params = [{transform_indices = @transform_0, window_bounds = array<i64: 1, 8, 32>}, {transform_indices = @transform_1, window_bounds = array<i64: 1, 1, 8>}, {pipeline_mode = #tpu.pipeline_mode<synchronous>, transform_indices = @transform_2, window_bounds = array<i64: 2, 32>}, {pipeline_mode = #tpu.pipeline_mode<synchronous>, transform_indices = @transform_3, window_bounds = array<i64: 2, 32, 96>}, {pipeline_mode = #tpu.pipeline_mode<synchronous>, transform_indices = @transform_4, window_bounds = array<i64: 2, 1, 96>}, {pipeline_mode = #tpu.pipeline_mode<synchronous>, transform_indices = @transform_5, window_bounds = array<i64: 2, 32, 32>}, {pipeline_mode = #tpu.pipeline_mode<synchronous>, transform_indices = @transform_6, window_bounds = array<i64: 2, 32, 64>}, {pipeline_mode = #tpu.pipeline_mode<synchronous>, transform_indices = @transform_7, window_bounds = array<i64: 2, 1, 64>}, {pipeline_mode = #tpu.pipeline_mode<synchronous>, transform_indices = @transform_8, window_bounds = array<i64: 2, 64, 32>}, {pipeline_mode = #tpu.pipeline_mode<synchronous>, transform_indices = @transform_9, window_bounds = array<i64: 2, 6, 32>}, {transform_indices = @transform_10, window_bounds = array<i64: 1, 8, 32>}]} {
    %c0 = arith.constant 0 : index
    %c0_0 = arith.constant 0 : index
    %c0_1 = arith.constant 0 : index
    %0 = vector.load %arg2[%c0, %c0_0, %c0_1] : memref<1x1x8xf32, #tpu.memory_space<vmem>>, vector<1x1x8xf32>
    %1 = vector.shape_cast %0 : vector<1x1x8xf32> to vector<1x8xf32>
    %c0_2 = arith.constant 0 : index
    %c0_3 = arith.constant 0 : index
    %2 = vector.load %arg3[%c0_2, %c0_3] : memref<2x32xf32, #tpu.memory_space<vmem>>, vector<2x32xf32>
    %c0_4 = arith.constant 0 : index
    %c0_5 = arith.constant 0 : index
    %c0_6 = arith.constant 0 : index
    %3 = vector.load %arg1[%c0_4, %c0_5, %c0_6] : memref<1x8x32xf32, #tpu.memory_space<vmem>>, vector<1x8x32xf32>
    %4 = vector.shape_cast %3 : vector<1x8x32xf32> to vector<8x32xf32>
    %5 = vector.extract_strided_slice %2 {offsets = [0, 0], sizes = [1, 32], strides = [1, 1]} : vector<2x32xf32> to vector<1x32xf32>
    %6 = vector.extract_strided_slice %2 {offsets = [1, 0], sizes = [1, 32], strides = [1, 1]} : vector<2x32xf32> to vector<1x32xf32>
    %cst = arith.constant dense<0.000000e+00> : vector<8xf32>
    %7 = vector.multi_reduction <add>, %4, %cst [1] : vector<8x32xf32> to vector<8xf32>
    %8 = vector.shape_cast %7 : vector<8xf32> to vector<8x1xf32>
    %cst_7 = arith.constant 3.200000e+01 : f32
    %9 = vector.broadcast %cst_7 : f32 to vector<8x1xf32>
    %10 = arith.divf %8, %9 : vector<8x1xf32>
    %11 = vector.broadcast %10 : vector<8x1xf32> to vector<8x32xf32>
    %12 = arith.subf %4, %11 : vector<8x32xf32>
    %13 = arith.mulf %12, %12 : vector<8x32xf32>
    %cst_8 = arith.constant dense<0.000000e+00> : vector<8xf32>
    %14 = vector.multi_reduction <add>, %13, %cst_8 [1] : vector<8x32xf32> to vector<8xf32>
    %15 = vector.shape_cast %14 : vector<8xf32> to vector<8x1xf32>
    %cst_9 = arith.constant 3.200000e+01 : f32
    %16 = vector.broadcast %cst_9 : f32 to vector<8x1xf32>
    %17 = arith.divf %15, %16 : vector<8x1xf32>
    %18 = vector.broadcast %10 : vector<8x1xf32> to vector<8x32xf32>
    %19 = arith.subf %4, %18 : vector<8x32xf32>
    %cst_10 = arith.constant 9.99999974E-6 : f32
    %20 = vector.broadcast %cst_10 : f32 to vector<8x1xf32>
    %21 = arith.addf %17, %20 : vector<8x1xf32>
    %22 = math.rsqrt %21 : vector<8x1xf32>
    %23 = vector.broadcast %22 : vector<8x1xf32> to vector<8x32xf32>
    %24 = arith.mulf %19, %23 : vector<8x32xf32>
    %25 = vector.broadcast %5 : vector<1x32xf32> to vector<8x32xf32>
    %26 = arith.mulf %24, %25 : vector<8x32xf32>
    %27 = vector.broadcast %6 : vector<1x32xf32> to vector<8x32xf32>
    %28 = arith.addf %26, %27 : vector<8x32xf32>
    %c0_11 = arith.constant 0 : index
    %c0_12 = arith.constant 0 : index
    %c0_13 = arith.constant 0 : index
    %29 = vector.load %arg4[%c0_11, %c0_12, %c0_13] : memref<2x32x96xbf16, #tpu.memory_space<vmem>>, vector<1x32x96xbf16>
    %30 = vector.shape_cast %29 : vector<1x32x96xbf16> to vector<32x96xbf16>
    %c0_14 = arith.constant 0 : index
    %c0_15 = arith.constant 0 : index
    %c0_16 = arith.constant 0 : index
    %31 = vector.load %arg6[%c0_14, %c0_15, %c0_16] : memref<2x32x32xbf16, #tpu.memory_space<vmem>>, vector<1x32x32xbf16>
    %32 = vector.shape_cast %31 : vector<1x32x32xbf16> to vector<32x32xbf16>
    %c0_17 = arith.constant 0 : index
    %c0_18 = arith.constant 0 : index
    %c0_19 = arith.constant 0 : index
    %33 = vector.load %arg7[%c0_17, %c0_18, %c0_19] : memref<2x32x64xbf16, #tpu.memory_space<vmem>>, vector<1x32x64xbf16>
    %34 = vector.shape_cast %33 : vector<1x32x64xbf16> to vector<32x64xbf16>
    %c0_20 = arith.constant 0 : index
    %c0_21 = arith.constant 0 : index
    %c0_22 = arith.constant 0 : index
    %35 = vector.load %arg9[%c0_20, %c0_21, %c0_22] : memref<2x64x32xbf16, #tpu.memory_space<vmem>>, vector<1x64x32xbf16>
    %36 = vector.shape_cast %35 : vector<1x64x32xbf16> to vector<64x32xbf16>
    %c0_23 = arith.constant 0 : index
    %c0_24 = arith.constant 0 : index
    %c0_25 = arith.constant 0 : index
    %37 = vector.load %arg5[%c0_23, %c0_24, %c0_25] : memref<2x1x96xf32, #tpu.memory_space<vmem>>, vector<1x1x96xf32>
    %38 = vector.shape_cast %37 : vector<1x1x96xf32> to vector<1x96xf32>
    %c0_26 = arith.constant 0 : index
    %c0_27 = arith.constant 0 : index
    %c0_28 = arith.constant 0 : index
    %39 = vector.load %arg8[%c0_26, %c0_27, %c0_28] : memref<2x1x64xf32, #tpu.memory_space<vmem>>, vector<1x1x64xf32>
    %40 = vector.shape_cast %39 : vector<1x1x64xf32> to vector<1x64xf32>
    %c0_29 = arith.constant 0 : index
    %c0_30 = arith.constant 0 : index
    %c0_31 = arith.constant 0 : index
    %41 = vector.load %arg10[%c0_29, %c0_30, %c0_31] : memref<2x6x32xf32, #tpu.memory_space<vmem>>, vector<1x6x32xf32>
    %42 = vector.shape_cast %41 : vector<1x6x32xf32> to vector<6x32xf32>
    %43 = vector.extract_strided_slice %42 {offsets = [0, 0], sizes = [1, 32], strides = [1, 1]} : vector<6x32xf32> to vector<1x32xf32>
    %44 = vector.extract_strided_slice %42 {offsets = [1, 0], sizes = [1, 32], strides = [1, 1]} : vector<6x32xf32> to vector<1x32xf32>
    %45 = vector.extract_strided_slice %42 {offsets = [2, 0], sizes = [1, 32], strides = [1, 1]} : vector<6x32xf32> to vector<1x32xf32>
    %46 = vector.extract_strided_slice %42 {offsets = [3, 0], sizes = [1, 32], strides = [1, 1]} : vector<6x32xf32> to vector<1x32xf32>
    %47 = vector.extract_strided_slice %42 {offsets = [4, 0], sizes = [1, 32], strides = [1, 1]} : vector<6x32xf32> to vector<1x32xf32>
    %48 = vector.extract_strided_slice %42 {offsets = [5, 0], sizes = [1, 32], strides = [1, 1]} : vector<6x32xf32> to vector<1x32xf32>
    %49 = arith.truncf %28 : vector<8x32xf32> to vector<8x32xbf16>
    %cst_32 = arith.constant dense<0.000000e+00> : vector<8x96xf32>
    %50 = tpu.matmul %49, %30, %cst_32 {dimension_numbers = #tpu.dot_dimension_numbers<[1], [0], [0], [1], [0, 0, 1, 1], [], []>} : vector<8x32xbf16>, vector<32x96xbf16>, vector<8x96xf32> -> vector<8x96xf32>
    %51 = vector.broadcast %38 : vector<1x96xf32> to vector<8x96xf32>
    %52 = arith.addf %50, %51 : vector<8x96xf32>
    %53 = vector.extract_strided_slice %52 {offsets = [0, 0], sizes = [8, 16], strides = [1, 1]} : vector<8x96xf32> to vector<8x16xf32>
    %54 = arith.truncf %53 : vector<8x16xf32> to vector<8x16xbf16>
    %55 = vector.extract_strided_slice %52 {offsets = [0, 32], sizes = [8, 16], strides = [1, 1]} : vector<8x96xf32> to vector<8x16xf32>
    %56 = arith.truncf %55 : vector<8x16xf32> to vector<8x16xbf16>
    %57 = vector.extract_strided_slice %52 {offsets = [0, 64], sizes = [8, 16], strides = [1, 1]} : vector<8x96xf32> to vector<8x16xf32>
    %58 = arith.truncf %57 : vector<8x16xf32> to vector<8x16xbf16>
    %cst_33 = arith.constant dense<0.000000e+00> : vector<8x8xf32>
    %59 = tpu.matmul %54, %56, %cst_33 {dimension_numbers = #tpu.dot_dimension_numbers<[1], [1], [0], [0], [0, 0, 1, 0], [], []>} : vector<8x16xbf16>, vector<8x16xbf16>, vector<8x8xf32> -> vector<8x8xf32>
    %cst_34 = arith.constant 2.500000e-01 : f32
    %60 = vector.broadcast %cst_34 : f32 to vector<8x8xf32>
    %61 = arith.mulf %59, %60 : vector<8x8xf32>
    %62 = vector.broadcast %1 : vector<1x8xf32> to vector<8x8xf32>
    %63 = arith.addf %61, %62 : vector<8x8xf32>
    %cst_35 = arith.constant dense<0xFF800000> : vector<8xf32>
    %64 = vector.multi_reduction <maximumf>, %63, %cst_35 [1] : vector<8x8xf32> to vector<8xf32>
    %65 = vector.shape_cast %64 : vector<8xf32> to vector<8x1xf32>
    %66 = vector.broadcast %65 : vector<8x1xf32> to vector<8x8xf32>
    %67 = arith.subf %63, %66 : vector<8x8xf32>
    %68 = math.exp %67 : vector<8x8xf32>
    %cst_36 = arith.constant dense<0.000000e+00> : vector<8xf32>
    %69 = vector.multi_reduction <add>, %68, %cst_36 [1] : vector<8x8xf32> to vector<8xf32>
    %70 = vector.shape_cast %69 : vector<8xf32> to vector<8x1xf32>
    %71 = tpu.reciprocal %70 {approx = true} : vector<8x1xf32> -> vector<8x1xf32>
    %72 = vector.broadcast %71 : vector<8x1xf32> to vector<8x8xf32>
    %73 = arith.mulf %68, %72 : vector<8x8xf32>
    %74 = arith.truncf %73 : vector<8x8xf32> to vector<8x8xbf16>
    %cst_37 = arith.constant dense<0.000000e+00> : vector<8x16xf32>
    %75 = tpu.matmul %74, %58, %cst_37 {dimension_numbers = #tpu.dot_dimension_numbers<[1], [0], [0], [1], [0, 0, 1, 1], [], []>} : vector<8x8xbf16>, vector<8x16xbf16>, vector<8x16xf32> -> vector<8x16xf32>
    %76 = vector.extract_strided_slice %52 {offsets = [0, 16], sizes = [8, 16], strides = [1, 1]} : vector<8x96xf32> to vector<8x16xf32>
    %77 = arith.truncf %76 : vector<8x16xf32> to vector<8x16xbf16>
    %78 = vector.extract_strided_slice %52 {offsets = [0, 48], sizes = [8, 16], strides = [1, 1]} : vector<8x96xf32> to vector<8x16xf32>
    %79 = arith.truncf %78 : vector<8x16xf32> to vector<8x16xbf16>
    %80 = vector.extract_strided_slice %52 {offsets = [0, 80], sizes = [8, 16], strides = [1, 1]} : vector<8x96xf32> to vector<8x16xf32>
    %81 = arith.truncf %80 : vector<8x16xf32> to vector<8x16xbf16>
    %cst_38 = arith.constant dense<0.000000e+00> : vector<8x8xf32>
    %82 = tpu.matmul %77, %79, %cst_38 {dimension_numbers = #tpu.dot_dimension_numbers<[1], [1], [0], [0], [0, 0, 1, 0], [], []>} : vector<8x16xbf16>, vector<8x16xbf16>, vector<8x8xf32> -> vector<8x8xf32>
    %cst_39 = arith.constant 2.500000e-01 : f32
    %83 = vector.broadcast %cst_39 : f32 to vector<8x8xf32>
    %84 = arith.mulf %82, %83 : vector<8x8xf32>
    %85 = vector.broadcast %1 : vector<1x8xf32> to vector<8x8xf32>
    %86 = arith.addf %84, %85 : vector<8x8xf32>
    %cst_40 = arith.constant dense<0xFF800000> : vector<8xf32>
    %87 = vector.multi_reduction <maximumf>, %86, %cst_40 [1] : vector<8x8xf32> to vector<8xf32>
    %88 = vector.shape_cast %87 : vector<8xf32> to vector<8x1xf32>
    %89 = vector.broadcast %88 : vector<8x1xf32> to vector<8x8xf32>
    %90 = arith.subf %86, %89 : vector<8x8xf32>
    %91 = math.exp %90 : vector<8x8xf32>
    %cst_41 = arith.constant dense<0.000000e+00> : vector<8xf32>
    %92 = vector.multi_reduction <add>, %91, %cst_41 [1] : vector<8x8xf32> to vector<8xf32>
    %93 = vector.shape_cast %92 : vector<8xf32> to vector<8x1xf32>
    %94 = tpu.reciprocal %93 {approx = true} : vector<8x1xf32> -> vector<8x1xf32>
    %95 = vector.broadcast %94 : vector<8x1xf32> to vector<8x8xf32>
    %96 = arith.mulf %91, %95 : vector<8x8xf32>
    %97 = arith.truncf %96 : vector<8x8xf32> to vector<8x8xbf16>
    %cst_42 = arith.constant dense<0.000000e+00> : vector<8x16xf32>
    %98 = tpu.matmul %97, %81, %cst_42 {dimension_numbers = #tpu.dot_dimension_numbers<[1], [0], [0], [1], [0, 0, 1, 1], [], []>} : vector<8x8xbf16>, vector<8x16xbf16>, vector<8x16xf32> -> vector<8x16xf32>
    %99 = tpu.concatenate %75, %98 in 1 : vector<8x16xf32>, vector<8x16xf32> -> vector<8x32xf32>
    %100 = arith.truncf %99 : vector<8x32xf32> to vector<8x32xbf16>
    %cst_43 = arith.constant dense<0.000000e+00> : vector<8x32xf32>
    %101 = tpu.matmul %100, %32, %cst_43 {dimension_numbers = #tpu.dot_dimension_numbers<[1], [0], [0], [1], [0, 0, 1, 1], [], []>} : vector<8x32xbf16>, vector<32x32xbf16>, vector<8x32xf32> -> vector<8x32xf32>
    %102 = vector.broadcast %43 : vector<1x32xf32> to vector<8x32xf32>
    %103 = arith.addf %101, %102 : vector<8x32xf32>
    %104 = arith.addf %28, %103 : vector<8x32xf32>
    %cst_44 = arith.constant dense<0.000000e+00> : vector<8xf32>
    %105 = vector.multi_reduction <add>, %104, %cst_44 [1] : vector<8x32xf32> to vector<8xf32>
    %106 = vector.shape_cast %105 : vector<8xf32> to vector<8x1xf32>
    %cst_45 = arith.constant 3.200000e+01 : f32
    %107 = vector.broadcast %cst_45 : f32 to vector<8x1xf32>
    %108 = arith.divf %106, %107 : vector<8x1xf32>
    %109 = vector.broadcast %108 : vector<8x1xf32> to vector<8x32xf32>
    %110 = arith.subf %104, %109 : vector<8x32xf32>
    %111 = arith.mulf %110, %110 : vector<8x32xf32>
    %cst_46 = arith.constant dense<0.000000e+00> : vector<8xf32>
    %112 = vector.multi_reduction <add>, %111, %cst_46 [1] : vector<8x32xf32> to vector<8xf32>
    %113 = vector.shape_cast %112 : vector<8xf32> to vector<8x1xf32>
    %cst_47 = arith.constant 3.200000e+01 : f32
    %114 = vector.broadcast %cst_47 : f32 to vector<8x1xf32>
    %115 = arith.divf %113, %114 : vector<8x1xf32>
    %116 = vector.broadcast %108 : vector<8x1xf32> to vector<8x32xf32>
    %117 = arith.subf %104, %116 : vector<8x32xf32>
    %cst_48 = arith.constant 9.99999974E-6 : f32
    %118 = vector.broadcast %cst_48 : f32 to vector<8x1xf32>
    %119 = arith.addf %115, %118 : vector<8x1xf32>
    %120 = math.rsqrt %119 : vector<8x1xf32>
    %121 = vector.broadcast %120 : vector<8x1xf32> to vector<8x32xf32>
    %122 = arith.mulf %117, %121 : vector<8x32xf32>
    %123 = vector.broadcast %44 : vector<1x32xf32> to vector<8x32xf32>
    %124 = arith.mulf %122, %123 : vector<8x32xf32>
    %125 = vector.broadcast %45 : vector<1x32xf32> to vector<8x32xf32>
    %126 = arith.addf %124, %125 : vector<8x32xf32>
    %127 = arith.truncf %126 : vector<8x32xf32> to vector<8x32xbf16>
    %cst_49 = arith.constant dense<0.000000e+00> : vector<8x64xf32>
    %128 = tpu.matmul %127, %34, %cst_49 {dimension_numbers = #tpu.dot_dimension_numbers<[1], [0], [0], [1], [0, 0, 1, 1], [], []>} : vector<8x32xbf16>, vector<32x64xbf16>, vector<8x64xf32> -> vector<8x64xf32>
    %129 = vector.broadcast %40 : vector<1x64xf32> to vector<8x64xf32>
    %130 = arith.addf %128, %129 : vector<8x64xf32>
    %cst_50 = arith.constant 5.000000e-01 : f32
    %131 = vector.broadcast %cst_50 : f32 to vector<8x64xf32>
    %132 = arith.mulf %131, %130 : vector<8x64xf32>
    %cst_51 = arith.constant 4.471500e-02 : f32
    %133 = vector.broadcast %cst_51 : f32 to vector<8x64xf32>
    %134 = arith.mulf %133, %130 : vector<8x64xf32>
    %135 = arith.mulf %134, %130 : vector<8x64xf32>
    %136 = arith.mulf %135, %130 : vector<8x64xf32>
    %137 = arith.addf %130, %136 : vector<8x64xf32>
    %cst_52 = arith.constant 0.797884583 : f32
    %138 = vector.broadcast %cst_52 : f32 to vector<8x64xf32>
    %139 = arith.mulf %138, %137 : vector<8x64xf32>
    %140 = math.tanh %139 : vector<8x64xf32>
    %cst_53 = arith.constant 1.000000e+00 : f32
    %141 = vector.broadcast %cst_53 : f32 to vector<8x64xf32>
    %142 = arith.addf %141, %140 : vector<8x64xf32>
    %143 = arith.mulf %132, %142 : vector<8x64xf32>
    %144 = arith.truncf %143 : vector<8x64xf32> to vector<8x64xbf16>
    %cst_54 = arith.constant dense<0.000000e+00> : vector<8x32xf32>
    %145 = tpu.matmul %144, %36, %cst_54 {dimension_numbers = #tpu.dot_dimension_numbers<[1], [0], [0], [1], [0, 0, 1, 1], [], []>} : vector<8x64xbf16>, vector<64x32xbf16>, vector<8x32xf32> -> vector<8x32xf32>
    %146 = vector.broadcast %46 : vector<1x32xf32> to vector<8x32xf32>
    %147 = arith.addf %145, %146 : vector<8x32xf32>
    %148 = arith.addf %126, %147 : vector<8x32xf32>
    %cst_55 = arith.constant dense<0.000000e+00> : vector<8xf32>
    %149 = vector.multi_reduction <add>, %148, %cst_55 [1] : vector<8x32xf32> to vector<8xf32>
    %150 = vector.shape_cast %149 : vector<8xf32> to vector<8x1xf32>
    %cst_56 = arith.constant 3.200000e+01 : f32
    %151 = vector.broadcast %cst_56 : f32 to vector<8x1xf32>
    %152 = arith.divf %150, %151 : vector<8x1xf32>
    %153 = vector.broadcast %152 : vector<8x1xf32> to vector<8x32xf32>
    %154 = arith.subf %148, %153 : vector<8x32xf32>
    %155 = arith.mulf %154, %154 : vector<8x32xf32>
    %cst_57 = arith.constant dense<0.000000e+00> : vector<8xf32>
    %156 = vector.multi_reduction <add>, %155, %cst_57 [1] : vector<8x32xf32> to vector<8xf32>
    %157 = vector.shape_cast %156 : vector<8xf32> to vector<8x1xf32>
    %cst_58 = arith.constant 3.200000e+01 : f32
    %158 = vector.broadcast %cst_58 : f32 to vector<8x1xf32>
    %159 = arith.divf %157, %158 : vector<8x1xf32>
    %160 = vector.broadcast %152 : vector<8x1xf32> to vector<8x32xf32>
    %161 = arith.subf %148, %160 : vector<8x32xf32>
    %cst_59 = arith.constant 9.99999974E-6 : f32
    %162 = vector.broadcast %cst_59 : f32 to vector<8x1xf32>
    %163 = arith.addf %159, %162 : vector<8x1xf32>
    %164 = math.rsqrt %163 : vector<8x1xf32>
    %165 = vector.broadcast %164 : vector<8x1xf32> to vector<8x32xf32>
    %166 = arith.mulf %161, %165 : vector<8x32xf32>
    %167 = vector.broadcast %47 : vector<1x32xf32> to vector<8x32xf32>
    %168 = arith.mulf %166, %167 : vector<8x32xf32>
    %169 = vector.broadcast %48 : vector<1x32xf32> to vector<8x32xf32>
    %170 = arith.addf %168, %169 : vector<8x32xf32>
    %c1 = arith.constant 1 : index
    %c0_60 = arith.constant 0 : index
    %c0_61 = arith.constant 0 : index
    %171 = vector.load %arg4[%c1, %c0_60, %c0_61] : memref<2x32x96xbf16, #tpu.memory_space<vmem>>, vector<1x32x96xbf16>
    %172 = vector.shape_cast %171 : vector<1x32x96xbf16> to vector<32x96xbf16>
    %c1_62 = arith.constant 1 : index
    %c0_63 = arith.constant 0 : index
    %c0_64 = arith.constant 0 : index
    %173 = vector.load %arg6[%c1_62, %c0_63, %c0_64] : memref<2x32x32xbf16, #tpu.memory_space<vmem>>, vector<1x32x32xbf16>
    %174 = vector.shape_cast %173 : vector<1x32x32xbf16> to vector<32x32xbf16>
    %c1_65 = arith.constant 1 : index
    %c0_66 = arith.constant 0 : index
    %c0_67 = arith.constant 0 : index
    %175 = vector.load %arg7[%c1_65, %c0_66, %c0_67] : memref<2x32x64xbf16, #tpu.memory_space<vmem>>, vector<1x32x64xbf16>
    %176 = vector.shape_cast %175 : vector<1x32x64xbf16> to vector<32x64xbf16>
    %c1_68 = arith.constant 1 : index
    %c0_69 = arith.constant 0 : index
    %c0_70 = arith.constant 0 : index
    %177 = vector.load %arg9[%c1_68, %c0_69, %c0_70] : memref<2x64x32xbf16, #tpu.memory_space<vmem>>, vector<1x64x32xbf16>
    %178 = vector.shape_cast %177 : vector<1x64x32xbf16> to vector<64x32xbf16>
    %c1_71 = arith.constant 1 : index
    %c0_72 = arith.constant 0 : index
    %c0_73 = arith.constant 0 : index
    %179 = vector.load %arg5[%c1_71, %c0_72, %c0_73] : memref<2x1x96xf32, #tpu.memory_space<vmem>>, vector<1x1x96xf32>
    %180 = vector.shape_cast %179 : vector<1x1x96xf32> to vector<1x96xf32>
    %c1_74 = arith.constant 1 : index
    %c0_75 = arith.constant 0 : index
    %c0_76 = arith.constant 0 : index
    %181 = vector.load %arg8[%c1_74, %c0_75, %c0_76] : memref<2x1x64xf32, #tpu.memory_space<vmem>>, vector<1x1x64xf32>
    %182 = vector.shape_cast %181 : vector<1x1x64xf32> to vector<1x64xf32>
    %c1_77 = arith.constant 1 : index
    %c0_78 = arith.constant 0 : index
    %c0_79 = arith.constant 0 : index
    %183 = vector.load %arg10[%c1_77, %c0_78, %c0_79] : memref<2x6x32xf32, #tpu.memory_space<vmem>>, vector<1x6x32xf32>
    %184 = vector.shape_cast %183 : vector<1x6x32xf32> to vector<6x32xf32>
    %185 = vector.extract_strided_slice %184 {offsets = [0, 0], sizes = [1, 32], strides = [1, 1]} : vector<6x32xf32> to vector<1x32xf32>
    %186 = vector.extract_strided_slice %184 {offsets = [1, 0], sizes = [1, 32], strides = [1, 1]} : vector<6x32xf32> to vector<1x32xf32>
    %187 = vector.extract_strided_slice %184 {offsets = [2, 0], sizes = [1, 32], strides = [1, 1]} : vector<6x32xf32> to vector<1x32xf32>
    %188 = vector.extract_strided_slice %184 {offsets = [3, 0], sizes = [1, 32], strides = [1, 1]} : vector<6x32xf32> to vector<1x32xf32>
    %189 = vector.extract_strided_slice %184 {offsets = [4, 0], sizes = [1, 32], strides = [1, 1]} : vector<6x32xf32> to vector<1x32xf32>
    %190 = vector.extract_strided_slice %184 {offsets = [5, 0], sizes = [1, 32], strides = [1, 1]} : vector<6x32xf32> to vector<1x32xf32>
    %191 = arith.truncf %170 : vector<8x32xf32> to vector<8x32xbf16>
    %cst_80 = arith.constant dense<0.000000e+00> : vector<8x96xf32>
    %192 = tpu.matmul %191, %172, %cst_80 {dimension_numbers = #tpu.dot_dimension_numbers<[1], [0], [0], [1], [0, 0, 1, 1], [], []>} : vector<8x32xbf16>, vector<32x96xbf16>, vector<8x96xf32> -> vector<8x96xf32>
    %193 = vector.broadcast %180 : vector<1x96xf32> to vector<8x96xf32>
    %194 = arith.addf %192, %193 : vector<8x96xf32>
    %195 = vector.extract_strided_slice %194 {offsets = [0, 0], sizes = [8, 16], strides = [1, 1]} : vector<8x96xf32> to vector<8x16xf32>
    %196 = arith.truncf %195 : vector<8x16xf32> to vector<8x16xbf16>
    %197 = vector.extract_strided_slice %194 {offsets = [0, 32], sizes = [8, 16], strides = [1, 1]} : vector<8x96xf32> to vector<8x16xf32>
    %198 = arith.truncf %197 : vector<8x16xf32> to vector<8x16xbf16>
    %199 = vector.extract_strided_slice %194 {offsets = [0, 64], sizes = [8, 16], strides = [1, 1]} : vector<8x96xf32> to vector<8x16xf32>
    %200 = arith.truncf %199 : vector<8x16xf32> to vector<8x16xbf16>
    %cst_81 = arith.constant dense<0.000000e+00> : vector<8x8xf32>
    %201 = tpu.matmul %196, %198, %cst_81 {dimension_numbers = #tpu.dot_dimension_numbers<[1], [1], [0], [0], [0, 0, 1, 0], [], []>} : vector<8x16xbf16>, vector<8x16xbf16>, vector<8x8xf32> -> vector<8x8xf32>
    %cst_82 = arith.constant 2.500000e-01 : f32
    %202 = vector.broadcast %cst_82 : f32 to vector<8x8xf32>
    %203 = arith.mulf %201, %202 : vector<8x8xf32>
    %204 = vector.broadcast %1 : vector<1x8xf32> to vector<8x8xf32>
    %205 = arith.addf %203, %204 : vector<8x8xf32>
    %cst_83 = arith.constant dense<0xFF800000> : vector<8xf32>
    %206 = vector.multi_reduction <maximumf>, %205, %cst_83 [1] : vector<8x8xf32> to vector<8xf32>
    %207 = vector.shape_cast %206 : vector<8xf32> to vector<8x1xf32>
    %208 = vector.broadcast %207 : vector<8x1xf32> to vector<8x8xf32>
    %209 = arith.subf %205, %208 : vector<8x8xf32>
    %210 = math.exp %209 : vector<8x8xf32>
    %cst_84 = arith.constant dense<0.000000e+00> : vector<8xf32>
    %211 = vector.multi_reduction <add>, %210, %cst_84 [1] : vector<8x8xf32> to vector<8xf32>
    %212 = vector.shape_cast %211 : vector<8xf32> to vector<8x1xf32>
    %213 = tpu.reciprocal %212 {approx = true} : vector<8x1xf32> -> vector<8x1xf32>
    %214 = vector.broadcast %213 : vector<8x1xf32> to vector<8x8xf32>
    %215 = arith.mulf %210, %214 : vector<8x8xf32>
    %216 = arith.truncf %215 : vector<8x8xf32> to vector<8x8xbf16>
    %cst_85 = arith.constant dense<0.000000e+00> : vector<8x16xf32>
    %217 = tpu.matmul %216, %200, %cst_85 {dimension_numbers = #tpu.dot_dimension_numbers<[1], [0], [0], [1], [0, 0, 1, 1], [], []>} : vector<8x8xbf16>, vector<8x16xbf16>, vector<8x16xf32> -> vector<8x16xf32>
    %218 = vector.extract_strided_slice %194 {offsets = [0, 16], sizes = [8, 16], strides = [1, 1]} : vector<8x96xf32> to vector<8x16xf32>
    %219 = arith.truncf %218 : vector<8x16xf32> to vector<8x16xbf16>
    %220 = vector.extract_strided_slice %194 {offsets = [0, 48], sizes = [8, 16], strides = [1, 1]} : vector<8x96xf32> to vector<8x16xf32>
    %221 = arith.truncf %220 : vector<8x16xf32> to vector<8x16xbf16>
    %222 = vector.extract_strided_slice %194 {offsets = [0, 80], sizes = [8, 16], strides = [1, 1]} : vector<8x96xf32> to vector<8x16xf32>
    %223 = arith.truncf %222 : vector<8x16xf32> to vector<8x16xbf16>
    %cst_86 = arith.constant dense<0.000000e+00> : vector<8x8xf32>
    %224 = tpu.matmul %219, %221, %cst_86 {dimension_numbers = #tpu.dot_dimension_numbers<[1], [1], [0], [0], [0, 0, 1, 0], [], []>} : vector<8x16xbf16>, vector<8x16xbf16>, vector<8x8xf32> -> vector<8x8xf32>
    %cst_87 = arith.constant 2.500000e-01 : f32
    %225 = vector.broadcast %cst_87 : f32 to vector<8x8xf32>
    %226 = arith.mulf %224, %225 : vector<8x8xf32>
    %227 = vector.broadcast %1 : vector<1x8xf32> to vector<8x8xf32>
    %228 = arith.addf %226, %227 : vector<8x8xf32>
    %cst_88 = arith.constant dense<0xFF800000> : vector<8xf32>
    %229 = vector.multi_reduction <maximumf>, %228, %cst_88 [1] : vector<8x8xf32> to vector<8xf32>
    %230 = vector.shape_cast %229 : vector<8xf32> to vector<8x1xf32>
    %231 = vector.broadcast %230 : vector<8x1xf32> to vector<8x8xf32>
    %232 = arith.subf %228, %231 : vector<8x8xf32>
    %233 = math.exp %232 : vector<8x8xf32>
    %cst_89 = arith.constant dense<0.000000e+00> : vector<8xf32>
    %234 = vector.multi_reduction <add>, %233, %cst_89 [1] : vector<8x8xf32> to vector<8xf32>
    %235 = vector.shape_cast %234 : vector<8xf32> to vector<8x1xf32>
    %236 = tpu.reciprocal %235 {approx = true} : vector<8x1xf32> -> vector<8x1xf32>
    %237 = vector.broadcast %236 : vector<8x1xf32> to vector<8x8xf32>
    %238 = arith.mulf %233, %237 : vector<8x8xf32>
    %239 = arith.truncf %238 : vector<8x8xf32> to vector<8x8xbf16>
    %cst_90 = arith.constant dense<0.000000e+00> : vector<8x16xf32>
    %240 = tpu.matmul %239, %223, %cst_90 {dimension_numbers = #tpu.dot_dimension_numbers<[1], [0], [0], [1], [0, 0, 1, 1], [], []>} : vector<8x8xbf16>, vector<8x16xbf16>, vector<8x16xf32> -> vector<8x16xf32>
    %241 = tpu.concatenate %217, %240 in 1 : vector<8x16xf32>, vector<8x16xf32> -> vector<8x32xf32>
    %242 = arith.truncf %241 : vector<8x32xf32> to vector<8x32xbf16>
    %cst_91 = arith.constant dense<0.000000e+00> : vector<8x32xf32>
    %243 = tpu.matmul %242, %174, %cst_91 {dimension_numbers = #tpu.dot_dimension_numbers<[1], [0], [0], [1], [0, 0, 1, 1], [], []>} : vector<8x32xbf16>, vector<32x32xbf16>, vector<8x32xf32> -> vector<8x32xf32>
    %244 = vector.broadcast %185 : vector<1x32xf32> to vector<8x32xf32>
    %245 = arith.addf %243, %244 : vector<8x32xf32>
    %246 = arith.addf %170, %245 : vector<8x32xf32>
    %cst_92 = arith.constant dense<0.000000e+00> : vector<8xf32>
    %247 = vector.multi_reduction <add>, %246, %cst_92 [1] : vector<8x32xf32> to vector<8xf32>
    %248 = vector.shape_cast %247 : vector<8xf32> to vector<8x1xf32>
    %cst_93 = arith.constant 3.200000e+01 : f32
    %249 = vector.broadcast %cst_93 : f32 to vector<8x1xf32>
    %250 = arith.divf %248, %249 : vector<8x1xf32>
    %251 = vector.broadcast %250 : vector<8x1xf32> to vector<8x32xf32>
    %252 = arith.subf %246, %251 : vector<8x32xf32>
    %253 = arith.mulf %252, %252 : vector<8x32xf32>
    %cst_94 = arith.constant dense<0.000000e+00> : vector<8xf32>
    %254 = vector.multi_reduction <add>, %253, %cst_94 [1] : vector<8x32xf32> to vector<8xf32>
    %255 = vector.shape_cast %254 : vector<8xf32> to vector<8x1xf32>
    %cst_95 = arith.constant 3.200000e+01 : f32
    %256 = vector.broadcast %cst_95 : f32 to vector<8x1xf32>
    %257 = arith.divf %255, %256 : vector<8x1xf32>
    %258 = vector.broadcast %250 : vector<8x1xf32> to vector<8x32xf32>
    %259 = arith.subf %246, %258 : vector<8x32xf32>
    %cst_96 = arith.constant 9.99999974E-6 : f32
    %260 = vector.broadcast %cst_96 : f32 to vector<8x1xf32>
    %261 = arith.addf %257, %260 : vector<8x1xf32>
    %262 = math.rsqrt %261 : vector<8x1xf32>
    %263 = vector.broadcast %262 : vector<8x1xf32> to vector<8x32xf32>
    %264 = arith.mulf %259, %263 : vector<8x32xf32>
    %265 = vector.broadcast %186 : vector<1x32xf32> to vector<8x32xf32>
    %266 = arith.mulf %264, %265 : vector<8x32xf32>
    %267 = vector.broadcast %187 : vector<1x32xf32> to vector<8x32xf32>
    %268 = arith.addf %266, %267 : vector<8x32xf32>
    %269 = arith.truncf %268 : vector<8x32xf32> to vector<8x32xbf16>
    %cst_97 = arith.constant dense<0.000000e+00> : vector<8x64xf32>
    %270 = tpu.matmul %269, %176, %cst_97 {dimension_numbers = #tpu.dot_dimension_numbers<[1], [0], [0], [1], [0, 0, 1, 1], [], []>} : vector<8x32xbf16>, vector<32x64xbf16>, vector<8x64xf32> -> vector<8x64xf32>
    %271 = vector.broadcast %182 : vector<1x64xf32> to vector<8x64xf32>
    %272 = arith.addf %270, %271 : vector<8x64xf32>
    %cst_98 = arith.constant 5.000000e-01 : f32
    %273 = vector.broadcast %cst_98 : f32 to vector<8x64xf32>
    %274 = arith.mulf %273, %272 : vector<8x64xf32>
    %cst_99 = arith.constant 4.471500e-02 : f32
    %275 = vector.broadcast %cst_99 : f32 to vector<8x64xf32>
    %276 = arith.mulf %275, %272 : vector<8x64xf32>
    %277 = arith.mulf %276, %272 : vector<8x64xf32>
    %278 = arith.mulf %277, %272 : vector<8x64xf32>
    %279 = arith.addf %272, %278 : vector<8x64xf32>
    %cst_100 = arith.constant 0.797884583 : f32
    %280 = vector.broadcast %cst_100 : f32 to vector<8x64xf32>
    %281 = arith.mulf %280, %279 : vector<8x64xf32>
    %282 = math.tanh %281 : vector<8x64xf32>
    %cst_101 = arith.constant 1.000000e+00 : f32
    %283 = vector.broadcast %cst_101 : f32 to vector<8x64xf32>
    %284 = arith.addf %283, %282 : vector<8x64xf32>
    %285 = arith.mulf %274, %284 : vector<8x64xf32>
    %286 = arith.truncf %285 : vector<8x64xf32> to vector<8x64xbf16>
    %cst_102 = arith.constant dense<0.000000e+00> : vector<8x32xf32>
    %287 = tpu.matmul %286, %178, %cst_102 {dimension_numbers = #tpu.dot_dimension_numbers<[1], [0], [0], [1], [0, 0, 1, 1], [], []>} : vector<8x64xbf16>, vector<64x32xbf16>, vector<8x32xf32> -> vector<8x32xf32>
    %288 = vector.broadcast %188 : vector<1x32xf32> to vector<8x32xf32>
    %289 = arith.addf %287, %288 : vector<8x32xf32>
    %290 = arith.addf %268, %289 : vector<8x32xf32>
    %cst_103 = arith.constant dense<0.000000e+00> : vector<8xf32>
    %291 = vector.multi_reduction <add>, %290, %cst_103 [1] : vector<8x32xf32> to vector<8xf32>
    %292 = vector.shape_cast %291 : vector<8xf32> to vector<8x1xf32>
    %cst_104 = arith.constant 3.200000e+01 : f32
    %293 = vector.broadcast %cst_104 : f32 to vector<8x1xf32>
    %294 = arith.divf %292, %293 : vector<8x1xf32>
    %295 = vector.broadcast %294 : vector<8x1xf32> to vector<8x32xf32>
    %296 = arith.subf %290, %295 : vector<8x32xf32>
    %297 = arith.mulf %296, %296 : vector<8x32xf32>
    %cst_105 = arith.constant dense<0.000000e+00> : vector<8xf32>
    %298 = vector.multi_reduction <add>, %297, %cst_105 [1] : vector<8x32xf32> to vector<8xf32>
    %299 = vector.shape_cast %298 : vector<8xf32> to vector<8x1xf32>
    %cst_106 = arith.constant 3.200000e+01 : f32
    %300 = vector.broadcast %cst_106 : f32 to vector<8x1xf32>
    %301 = arith.divf %299, %300 : vector<8x1xf32>
    %302 = vector.broadcast %294 : vector<8x1xf32> to vector<8x32xf32>
    %303 = arith.subf %290, %302 : vector<8x32xf32>
    %cst_107 = arith.constant 9.99999974E-6 : f32
    %304 = vector.broadcast %cst_107 : f32 to vector<8x1xf32>
    %305 = arith.addf %301, %304 : vector<8x1xf32>
    %306 = math.rsqrt %305 : vector<8x1xf32>
    %307 = vector.broadcast %306 : vector<8x1xf32> to vector<8x32xf32>
    %308 = arith.mulf %303, %307 : vector<8x32xf32>
    %309 = vector.broadcast %189 : vector<1x32xf32> to vector<8x32xf32>
    %310 = arith.mulf %308, %309 : vector<8x32xf32>
    %311 = vector.broadcast %190 : vector<1x32xf32> to vector<8x32xf32>
    %312 = arith.addf %310, %311 : vector<8x32xf32>
    %c0_108 = arith.constant 0 : index
    %c0_109 = arith.constant 0 : index
    %c0_110 = arith.constant 0 : index
    %313 = vector.load %arg11[%c0_108, %c0_109, %c0_110] : memref<1x8x32xf32, #tpu.memory_space<vmem>>, vector<1x8x32xf32>
    %314 = vector.shape_cast %313 : vector<1x8x32xf32> to vector<8x32xf32>
    %315 = vector.shape_cast %312 : vector<8x32xf32> to vector<1x8x32xf32>
    tpu.vector_store %arg11[%c0_108, %c0_109, %c0_110], %315 {strides = array<i32>} : memref<1x8x32xf32, #tpu.memory_space<vmem>>, vector<1x8x32xf32>,
    return
  }
  func.func @transform_0(%arg0: i32) -> (i32, i32, i32) {
    %c0_i32 = arith.constant 0 : i32
    %c0_i32_0 = arith.constant 0 : i32
    %c0_i32_1 = arith.constant 0 : i32
    return %arg0, %c0_i32, %c0_i32_0 : i32, i32, i32
  }
  func.func @transform_1(%arg0: i32) -> (i32, i32, i32) {
    %c0_i32 = arith.constant 0 : i32
    %c0_i32_0 = arith.constant 0 : i32
    %c0_i32_1 = arith.constant 0 : i32
    return %arg0, %c0_i32, %c0_i32_0 : i32, i32, i32
  }
  func.func @transform_2(%arg0: i32) -> (i32, i32) {
    %c0_i32 = arith.constant 0 : i32
    %c0_i32_0 = arith.constant 0 : i32
    %c0_i32_1 = arith.constant 0 : i32
    return %c0_i32, %c0_i32_0 : i32, i32
  }
  func.func @transform_3(%arg0: i32) -> (i32, i32, i32) {
    %c0_i32 = arith.constant 0 : i32
    %c0_i32_0 = arith.constant 0 : i32
    %c0_i32_1 = arith.constant 0 : i32
    %c0_i32_2 = arith.constant 0 : i32
    return %c0_i32, %c0_i32_0, %c0_i32_1 : i32, i32, i32
  }
  func.func @transform_4(%arg0: i32) -> (i32, i32, i32) {
    %c0_i32 = arith.constant 0 : i32
    %c0_i32_0 = arith.constant 0 : i32
    %c0_i32_1 = arith.constant 0 : i32
    %c0_i32_2 = arith.constant 0 : i32
    return %c0_i32, %c0_i32_0, %c0_i32_1 : i32, i32, i32
  }
  func.func @transform_5(%arg0: i32) -> (i32, i32, i32) {
    %c0_i32 = arith.constant 0 : i32
    %c0_i32_0 = arith.constant 0 : i32
    %c0_i32_1 = arith.constant 0 : i32
    %c0_i32_2 = arith.constant 0 : i32
    return %c0_i32, %c0_i32_0, %c0_i32_1 : i32, i32, i32
  }
  func.func @transform_6(%arg0: i32) -> (i32, i32, i32) {
    %c0_i32 = arith.constant 0 : i32
    %c0_i32_0 = arith.constant 0 : i32
    %c0_i32_1 = arith.constant 0 : i32
    %c0_i32_2 = arith.constant 0 : i32
    return %c0_i32, %c0_i32_0, %c0_i32_1 : i32, i32, i32
  }
  func.func @transform_7(%arg0: i32) -> (i32, i32, i32) {
    %c0_i32 = arith.constant 0 : i32
    %c0_i32_0 = arith.constant 0 : i32
    %c0_i32_1 = arith.constant 0 : i32
    %c0_i32_2 = arith.constant 0 : i32
    return %c0_i32, %c0_i32_0, %c0_i32_1 : i32, i32, i32
  }
  func.func @transform_8(%arg0: i32) -> (i32, i32, i32) {
    %c0_i32 = arith.constant 0 : i32
    %c0_i32_0 = arith.constant 0 : i32
    %c0_i32_1 = arith.constant 0 : i32
    %c0_i32_2 = arith.constant 0 : i32
    return %c0_i32, %c0_i32_0, %c0_i32_1 : i32, i32, i32
  }
  func.func @transform_9(%arg0: i32) -> (i32, i32, i32) {
    %c0_i32 = arith.constant 0 : i32
    %c0_i32_0 = arith.constant 0 : i32
    %c0_i32_1 = arith.constant 0 : i32
    %c0_i32_2 = arith.constant 0 : i32
    return %c0_i32, %c0_i32_0, %c0_i32_1 : i32, i32, i32
  }
  func.func @transform_10(%arg0: i32) -> (i32, i32, i32) {
    %c0_i32 = arith.constant 0 : i32
    %c0_i32_0 = arith.constant 0 : i32
    %c0_i32_1 = arith.constant 0 : i32
    return %arg0, %c0_i32, %c0_i32_0 : i32, i32, i32
  }
}

</mosaic_0001>

<bundles_post_ra>
// kernel: tpu_custom_call.1
= control target key start
LH: loop header
LB: loop body
LE: loop exit
PB: predicated region body
PF: predicated region fallthrough
CT: control target
= control target key end

     0   :  { %s2177_s0 = inlined_call_operand.hbm [shape: f32[2,8,32], index: 0, kind: input, shape index: {}]   ;;  %s2178_s1 = inlined_call_operand.vmem [shape: f32[2,1,8], index: 1, kind: input, shape index: {}]   ;;  %s2179_s2 = inlined_call_operand.hbm [shape: f32[2,32], index: 2, kind: input, shape index: {}]   ;;  %s2180_s3 = inlined_call_operand.vmem [shape: bf16[2,32,96], index: 3, kind: input, shape index: {}]   ;;  %s2181_s4 = inlined_call_operand.hbm [shape: f32[2,1,96], index: 4, kind: input, shape index: {}]   ;;  %s2182_s5 = inlined_call_operand.vmem [shape: bf16[2,32,32], index: 5, kind: input, shape index: {}]   ;;  %s2183_s6 = inlined_call_operand.vmem [shape: bf16[2,32,64], index: 6, kind: input, shape index: {}]   ;;  %s2184_s7 = inlined_call_operand.hbm [shape: f32[2,1,64], index: 7, kind: input, shape index: {}]   ;;  %s2185_s8 = inlined_call_operand.vmem [shape: bf16[2,64,32], index: 8, kind: input, shape index: {}]   ;;  %s2186_s9 = inlined_call_operand.vmem [shape: f32[2,6,32], index: 9, kind: input, shape index: {}]   ;;  %s2187_s10 = inlined_call_operand.hbm [shape: f32[2,8,32], index: 10, kind: output, shape index: {}]  }
   0x1   :  { %2189 = sst [smem:[#allocation16_spill]] %s2179_s2 }
   0x2   :  { %2190 = sst [smem:[#allocation17_spill]] %s2181_s4 }
   0x3   :  { %2191 = sst [smem:[#allocation18_spill]] %s2184_s7 }
   0x4   :  { %15 = vsyncpa [#allocation3], 0 }
   0x5   :  { %17 = vsyncpa [#allocation3 + $0x1], 0 }
   0x6   :  { %18 = vsyncpa [#allocation6], 0 }
   0x7   :  { %19 = vsyncpa [#allocation9], 0 }
   0x8   :  { %20 = vsyncpa [#allocation4], 0 }
   0x9   :  { %22 = vsyncpa [#allocation4 + $0x1], 0  ;;  %s1843_s13 = smov 0   ;;  %s1845_s14 = smov 0  }
   0xa   :  { %s1847_s15 = smov 0   ;;  %s1849_s16 = smov 0  }
   0xb LB: > { %s1864_s17 = sadd.s32 4294967295, %s1774_s16   ;;  %s1302_s18 = sadd.s32 4294967294, %s1774_s16   ;;  %s1774_s16 = sphi %s1849_s16, %s2208_s16   ;;  %s1770_s15 = sphi %s1847_s15, %s2207_s15   ;;  %s1766_s14 = sphi %s1845_s14, %s2206_s14   ;;  %s1762_s13 = sphi %s1843_s13, %s2205_s13  }
   0xc   : > { %p48_p0 = scmp.ne.s32.totalorder %s1766_s14, %s1762_s13  ;;  %p49_p1 = scmp.eq.s32.totalorder %s1864_s17, 0 }
   0xd   : > { %p266_p2 = scmp.eq.s32.totalorder %s1864_s17, 1  ;;  %p272_p3 = scmp.eq.s32.totalorder %s1302_s18, 1 }
   0xe   : > { %p1873_p4 = por %p49_p1, %p48_p0  ;;  %p1303_p5 = scmp.ge.s32.totalorder %s1774_s16, 1 }
   0xf   : > { %p1878_p6 = por %p272_p3, %p48_p0  ;;  %p279_p7 = scmp.lt.s32.totalorder %s1774_s16, 3 }
  0x10   : > { %s2194_s2 = sld [smem:[#allocation16_spill]]  ;;  %s1776_s25 = smov [#allocation5]  }
  0x11   : > { %p1886_p8 = pnand %p1303_p5, %p279_p7  ;;  %s293_s26 = sshll.u32 %s1776_s25, 4  ;;  %s294_s26 = int_to_ptr.vmem [resolvable:$true] %s293_s26 }
  0x12   : > { %s2196_s4 = sld [smem:[#allocation17_spill]]  ;;  %s1777_s11 = smov [#allocation7]  }
  0x13   : > { %p1473_p10 = pneg %p1886_p8  ;;  %s307_s12 = sshll.u32 %s1777_s11, 4  ;;  %s308_s12 = int_to_ptr.vmem [resolvable:$true] %s307_s12 }
  0x14   : > { %s1778_s18 = smov 16   ;;  %s1779_s21 = smov 1  }
  0x15   : > { %p1898_p11 = pnand %p1473_p10, %p49_p1  ;;  %s2198_s7 = sld [smem:[#allocation18_spill]] }
  0x16   : > { %s291_s23 = sshll.u32 %s2194_s2, 4  ;;  %s1780_s28 = smov [#allocation8]   ;;  %s292_s23 = int_to_ptr.hbm [resolvable:$true] %s291_s23 }
  0x17   : > { %1476 = dma.hbm_to_vmem [thread:$0]  (!%p1898_p11), %s292_s23, 32, %s294_s26, [#allocation6]  }
  0x18   : > { %s305_s29 = sshll.u32 %s2196_s4, 4  ;;  %s327_s11 = sshll.u32 %s1780_s28, 4  ;;  %s306_s29 = int_to_ptr.hbm [resolvable:$true] %s305_s29  ;;  %s328_s11 = int_to_ptr.vmem [resolvable:$true] %s327_s11 }
  0x19   : > { %1479 = dma.hbm_to_vmem [thread:$0]  (!%p1898_p11), %s306_s29, 32, %s308_s12, [#allocation6], %s1778_s18, %s1778_s18, %s1779_s21  }
  0x1a   : > { %s1912_s23 = sadd.s32 1, %s1774_s16   ;;  %s35_s2 = sadd.s32 1, %s1770_s15 }
  0x1b   : > { %s325_s27 = sshll.u32 %s2198_s7, 4  ;;  %s32_s26 = ssub.s32 %s1774_s16, %s1912_s23  ;;  %s326_s27 = int_to_ptr.hbm [resolvable:$true] %s325_s27 }
  0x1c   : > { %1482 = dma.hbm_to_vmem [thread:$0]  (!%p1898_p11), %s326_s27, 32, %s328_s11, [#allocation9], %s1778_s18, %s1778_s18, %s1779_s21  }
  0x1d   : > { %p33_p12 = scmp.eq.s32.totalorder %s32_s26, 0  ;;  %p42_p13 = scmp.ne.s32.totalorder %s1770_s15, %s1766_s14 }
  0x1e   : > { %p43_p0 = scmp.eq.s32.totalorder %s1774_s16, 0  ;;  %p1494_p5 = scmp.lt.s32.totalorder %s1774_s16, 2 }
  0x1f   : > { %s1921_s29 = scalar_select %p33_p12, %s1770_s15, %s35_s2  }
  0x20   : > { %p1925_p3 = por %p266_p2, %p42_p13  ;;  %s347_s22 = sand.u32 1, %s1770_s15  }
  0x21   : > { %2199 = sst [smem:[#allocation15_spill]] %s1921_s29  ;;  %s1309_s25 = sshll.u32 %s1774_s16, 3 }
  0x22   : > { %p44_p7 = por %p43_p0, %p42_p13  ;;  %s1308_s30 = sshll.u32 %s347_s22, 3 }
  0x23   : > { %s355_s27 = scalar_lea.hbm %s2177_s0, %s1309_s25  ;;  %s351_s11 = scalar_lea.vmem [#allocation2], %s1308_s30 }
  0x24   : > { %s357_s28 = sshll.u32 %s355_s27, 4  ;;  %s359_s26 = sshll.u32 %s351_s11, 4  ;;  %s358_s28 = int_to_ptr.hbm [resolvable:$true] %s357_s28  ;;  %s360_s26 = int_to_ptr.vmem [resolvable:$true] %s359_s26 }
  0x25   : > { %p1935_p10 = pnand %p1494_p5, %p44_p7  ;;  %s348_s4 = scalar_lea.sflag [#allocation3], %s347_s22 }
  0x26   : > { %s1670_s7 = sshra.s32 %s358_s28, 4  ;;  %s1677_s30 = scalar_lea.hbm %s2177_s0, 16  ;;  %s1671_s7 = int_to_ptr.hbm [resolvable:$true] %s1670_s7 }
  0x27   : > { %s1672_s29 = scalar_lea.hbm %s1671_s7, 8  ;;  %p1674_p11 = pneg %p1935_p10 }
  0x28   : > { %p1673_p2 = scmp.ne.s32.totalorder %s1671_s7, %s1672_s29  ;;  %p1678_p0 = scmp.lt.s32.totalorder %s1671_s7, %s2177_s0 }
  0x29   : > { %p1679_p5 = scmp.lt.s32.totalorder %s1677_s30, %s1672_s29 }
  0x2a   : > { %p1675_p12 = pnand %p1674_p11, %p1673_p2 }
  0x2b   : > { %p1680_p7 = por %p1679_p5, %p1678_p0 }
  0x2c   : > { %p1676_p13 = pneg %p1675_p12 }
  0x2e   : > { %p1681_p9 = pnand %p1680_p7, %p1676_p13 }
  0x30   : > { %1684 = shalt.err (!%p1681_p9)
}
  0x31   : > { %1486 = dma.hbm_to_vmem [thread:$0]  (!%p1935_p10), %s358_s28, 128, %s360_s26, %s348_s4  }
  0x32   : > { %374 = sbr.rel (%p1886_p8) target bundleno = 4052 (0xfd4), region = 60  ;;  %s1952_s22 = sand.u32 (!%p1886_p8), 1, %s1766_s14  }
  0x33   : > { %s2188_s11 = sshll.u32 (!%p1886_p8), %s1952_s22, 3  ;;  %s377_s25 = scalar_lea.sflag (!%p1886_p8), [#allocation3], %s1952_s22 }
  0x34   : > { %s380_s7 = scalar_lea.vmem (!%p1886_p8), [#allocation2], %s2188_s11 }
  0x37   : > { %1745 = dma.done.wait (%p1873_p4), %s377_s25, 128  }
  0x38   : > { %1747 = vsyncadd (%p1873_p4), %s377_s25, 4294967168 }
  0x39   : > { %1749 = dma.done.wait (%p49_p1), [#allocation6], 64  }
  0x3a   : > { %1751 = vsyncadd (%p49_p1), [#allocation6], 4294967232 }
  0x3b   : > { %1753 = dma.done.wait (%p49_p1), [#allocation9], 32  }
  0x3c   : > { %1755 = vsyncadd (%p49_p1), [#allocation9], 4294967264  ;;  %vm443_vm0 = vcmask 261120   ;;  %v442_v0 = vld [vmem:[%s380_s7] sm:$0xff]  ;;  %v1781_v2 = vmov 32.0   ;;  %s1782_s28 = smov 112  }
  0x3d   : > { %v444_v1 = vsel %vm443_vm0, %v442_v0, 0.0  ;;  %1548 = vrcp.f32 %v1781_v2  ;;  %v1438_v14 = vld [vmem:[%s2180_s3 + $0x8] sm:$0xff]  ;;  %v1437_v15 = vld [vmem:[%s2180_s3] sm:$0xff]  ;;  %v441_v24 = vld [vmem:[#allocation5] sm:$0x3]  ;;  %s1783_s26 = smov 96  }
  0x3e   : > { %445 = vadd.xlane.f32.xlu0 %v444_v1  ;;  %525 = vmatpush.bf16.msra.mxu0 %v1438_v14  ;;  %v473_v26 = vperm.slane %v441_v24, 0  ;;  %v475_v29 = vperm.slane %v441_v24, 1  ;;  %v1543_v33 = vld [vmem:[#allocation7] ss:$0 sm:$0xff]  ;;  %s1784_s2 = smov 80   ;;  %vm536_vm5 = vcmask 130048  }
  0x3f   : > { %p436_p1 = scmp.lt.s32.totalorder %s1864_s17, 1  ;;  %vm561_vm6 = vcmask 64512   ;;  %s1785_s25 = smov 48   ;;  %vm579_vm7 = vcmask 1043456   ;;  %vm783_vm11 = vcmask 523264  }
  0x40   : > { %s1786_s7 = smov 64   ;;  %s1787_s24 = smov 16  }
  0x41   : > { %s437_s18 = scalar_select %p436_p1, %s1864_s17, 1 }
  0x42   : > { %526 = vmatpush.bf16.msra.mxu0 %v1437_v15  ;;  %s2202_s19 = sshll.u32 %s1952_s22, 3 }
  0x43   : > { %v1549_v3 = vpop.eup %1548  ;;  %s438_s27 = scalar_lea.vmem %s2178_s1, %s437_s18  ;;  %s435_s29 = scalar_lea.vmem [#allocation10], %s2202_s19 }
  0x44   : > { %v448_v4 = vmul.f32 32.0, %v1549_v3  ;;  %vm452_vm1 = vweird.f32 %v1549_v3  ;;  %v1999_v43 = vld [vmem:[%s438_s27] ss:$0 sm:$0xff]  ;;  %s1191_s11 = sshll.u32 %s435_s29, 4  ;;  %s1192_s11 = int_to_ptr.vmem [resolvable:$true] %s1191_s11 }
  0x46   : > { %v449_v5 = vsub.f32 1.0, %v448_v4 }
  0x48   : > { %v450_v6 = vmul.f32 %v1549_v3, %v449_v5 }
  0x4a   : > { %v451_v7 = vadd.f32 %v1549_v3, %v450_v6 }
  0x4c   : > { %v1971_v8 = vsel %vm452_vm1, %v1549_v3, %v451_v7 }
  0xb1   : > { %v446_v9 = vpop.xlane.xlu0 %445 }
  0xb2   : > { %v454_v10 = vmul.f32 %v1971_v8, %v446_v9 }
  0xb4   : > { %v455_v11 = vsub.f32 %v442_v0, %v454_v10 }
  0xb6   : > { %v456_v12 = vmul.f32 %v455_v11, %v455_v11 }
  0xb8   : > { %v457_v13 = vsel %vm443_vm0, %v456_v12, 0.0 }
  0xb9   : > { %458 = vadd.xlane.f32.xlu0 %v457_v13  ;;  %v1440_v13 = vld [vmem:[%s2182_s5 + $0x8] sm:$0xff] }
  0xba   : > { %682 = vmatpush.bf16.msrb.mxu0 %v1440_v13 }
 0x12c   : > { %v459_v16 = vpop.xlane.xlu0 %458 }
 0x12d   : > { %v460_v17 = vmul.f32 %v459_v16, %v1971_v8 }
 0x12f   : > { %v461_v18 = vadd.f32 1e-05, %v460_v17 }
 0x131   : > { %1550 = vrsqrt.f32 %v461_v18  ;;  %vm468_vm3 = vweird.f32 %v461_v18 }
 0x137   : > { %v1551_v19 = vpop.eup %1550 }
 0x138   : > { %v463_v20 = vmul.f32 %v1551_v19, %v461_v18  ;;  %vm469_vm2 = vweird.f32 %v1551_v19  ;;  %v1439_v18 = vld [vmem:[%s2182_s5] sm:$0xff] }
 0x139   : > { %vm470_vm4 = vmor %vm468_vm3, %vm469_vm2  ;;  %683 = vmatpush.bf16.msrb.mxu0 %v1439_v18 }
 0x13a   : > { %v464_v21 = vmul.f32 %v1551_v19, %v463_v20 }
 0x13c   : > { %v465_v22 = vmul.f32 0.5, %v464_v21 }
 0x13e   : > { %v466_v23 = vsub.f32 1.5, %v465_v22  ;;  %v2025_v22 = vld [vmem:[%s2186_s9] sm:$0x3f] }
 0x140   : > { %v467_v25 = vmul.f32 %v1551_v19, %v466_v23  ;;  %v660_v23 = vperm.slane %v2025_v22, 0 }
 0x142   : > { %v471_v27 = vsel %vm470_vm4, %v1551_v19, %v467_v25 }
 0x143   : > { %v472_v28 = vmul.f32 %v471_v27, %v455_v11 }
 0x145   : > { %v474_v30 = vmul.f32 %v473_v26, %v472_v28 }
 0x147   : > { %v1982_v31 = vadd.f32 %v475_v29, %v474_v30 }
 0x149   : > { %v500_v32 = vpack.c.bf16 %v1982_v31, %v1982_v31 }
 0x14b   : > { %1324 = vmatmul.msk.bf16.vlgmr.msra.gmra.mxu0 %vm443_vm0, %v500_v32 }
 0x1c8   : > { %v528_v34 = vpop.f32.mrf.mxu0 }
 0x1c9   : > { %v529_v35 = vadd.f32 %v1543_v33, %v528_v34 }
 0x1cb   : > { %v532_v36 = vpack.c.bf16 %v529_v35, %v529_v35  ;;  %v1442_v35 = vld [vmem:[%s2183_s6 + $0x8] sm:$0xff] }
 0x1cd   : > { %596 = vrot.lane.b32.xlu2 %v532_v36, %s1782_s28  ;;  %534 = vrot.lane.b32.xlu1 %v532_v36, %s1783_s26 }
 0x1d0   : > { %v530_v37 = vpop.f32.mrf.mxu0 }
 0x1d5   : > { %598 = vrot.lane.b32.xlu1 %v532_v36, %s1784_s2 }
 0x227   : > { %v597_v42 = vpop.permute.xlu2 %596 }
 0x23f   : > { %v535_v38 = vpop.permute.xlu1 %534 }
 0x240   : > { %v541_v39 = vsel %vm536_vm5, %v535_v38, 0 }
 0x241   : > { %550 = vmatpush.bf16.xpose.msra.mxu1 %v541_v39 }
 0x247   : > { %v599_v40 = vpop.permute.xlu1 %598 }
 0x248   : > { %1325 = vmatmul.msk.bf16.vlgmr.msra.gmra.mxu1 %vm536_vm5, %v532_v36  ;;  %v604_v41 = vsel %vm536_vm5, %v599_v40, 0 }
 0x249   : > { %613 = vmatpush.bf16.xpose.msra.mxu3 %v604_v41  ;;  %741 = vmatpush.bf16.msrb.mxu1 %v1442_v35 }
 0x250   : > { %1327 = vmatmul.msk.bf16.vlgmr.msra.gmra.mxu3 %vm536_vm5, %v597_v42 }
 0x2c5   : > { %v552_v44 = vpop.f32.mrf.mxu1 }
 0x2c6   : > { %v556_v45 = vmul.f32 0.25, %v552_v44 }
 0x2c8   : > { %v560_v46 = vadd.f32 %v1999_v43, %v556_v45 }
 0x2ca   : > { %v562_v47 = vsel %vm561_vm6, %v560_v46, -inf }
 0x2cb   : > { %563 = vmax.xlane.f32.xlu2 %v562_v47 }
 0x2cd   : > { %v554_v48 = vpop.f32.mrf.mxu1 }
 0x2d3   : > { %v615_v49 = vpop.f32.mrf.mxu3 }
 0x2d4   : > { %v619_v50 = vmul.f32 0.25, %v615_v49  ;;  %v714_v49 = vperm.slane %v2025_v22, 2 }
 0x2d6   : > { %v620_v51 = vadd.f32 %v1999_v43, %v619_v50 }
 0x2d8   : > { %v621_v52 = vsel %vm561_vm6, %v620_v51, -inf }
 0x2d9   : > { %622 = vmax.xlane.f32.xlu0 %v621_v52 }
 0x2db   : > { %v617_v53 = vpop.f32.mrf.mxu3 }
 0x2dc   : > { %v1446_v53 = vld [vmem:[%s2185_s8 + $0x18] sm:$0xff] }
 0x2dd   : > { %791 = vmatpush.bf16.msrb.mxu3 %v1446_v53 }
 0x2e3   : > { %633 = vrot.lane.b32.xlu2 %v532_v36, %s1785_s25 }
 0x2ed   : > { %574 = vrot.lane.b32.xlu0 %v532_v36, %s1786_s7 }
 0x33e   : > { %v564_v54 = vpop.xlane.xlu2 %563 }
 0x33f   : > { %v565_v55 = vsub.f32 %v560_v46, %v564_v54  ;;  %v712_v46 = vperm.slane %v2025_v22, 1  ;;  %v1445_v54 = vld [vmem:[%s2185_s8 + $0x10] sm:$0xff] }
 0x340   : > { %792 = vmatpush.bf16.msrb.mxu3 %v1445_v54 }
 0x341   : > { %v566_v56 = vmul.f32 1.442695, %v565_v55  ;;  %v1444_v55 = vld [vmem:[%s2185_s8 + $0x8] sm:$0xff] }
 0x343   : > { %1552 = vpow2.f32 %v566_v56  ;;  %v1443_v56 = vld [vmem:[%s2185_s8] sm:$0xff] }
 0x344   : > { %793 = vmatpush.bf16.msrb.mxu3 %v1444_v55 }
 0x346   : > { %v634_v0 = vpop.permute.xlu2 %633 }
 0x347   : > { %v639_v3 = vsel %vm579_vm7, %v634_v0, 0 }
 0x348   : > { %794 = vmatpush.bf16.msrb.mxu3 %v1443_v56 }
 0x349   : > { %v1553_v57 = vpop.eup %1552 }
 0x34a   : > { %v568_v58 = vsel %vm561_vm6, %v1553_v57, 0.0 }
 0x34b   : > { %569 = vadd.xlane.f32.xlu1 %v568_v58 }
 0x34c   : > { %v623_v59 = vpop.xlane.xlu0 %622 }
 0x34d   : > { %v624_v60 = vsub.f32 %v620_v51, %v623_v59 }
 0x34f   : > { %v625_v61 = vmul.f32 1.442695, %v624_v60 }
 0x351   : > { %1554 = vpow2.f32 %v625_v61 }
 0x357   : > { %v1555_v62 = vpop.eup %1554 }
 0x358   : > { %v627_v63 = vsel %vm561_vm6, %v1555_v62, 0.0 }
 0x359   : > { %628 = vadd.xlane.f32.xlu0 %v627_v63 }
 0x35f   : > { %v575_v1 = vpop.permute.xlu0 %574 }
 0x360   : > { %v581_v2 = vsel %vm579_vm7, %v575_v1, 0 }
 0x361   : > { %590 = vmatpush.bf16.msra.mxu2 %v581_v2 }
 0x365   : > { %648 = vmatpush.bf16.msrb.mxu2 %v639_v3 }
 0x3be   : > { %v570_v4 = vpop.xlane.xlu1 %569 }
 0x3bf   : > { %1556 = vrcp.f32 %v570_v4 }
 0x3c5   : > { %v1557_v5 = vpop.eup %1556 }
 0x3c6   : > { %v572_v6 = vmul.f32 %v1557_v5, %v1553_v57  ;;  %v1545_v57 = vld [vmem:[#allocation8] ss:$0 sm:$0xff] }
 0x3c8   : > { %v573_v7 = vpack.c.bf16 %v572_v6, %v572_v6 }
 0x3ca   : > { %1326 = vmatmul.msk.bf16.vlgmr.msra.gmra.mxu2 %vm561_vm6, %v573_v7  ;;  %v758_v7 = vperm.slane %v2025_v22, 3 }
 0x3cc   : > { %v629_v9 = vpop.xlane.xlu0 %628 }
 0x3cd   : > { %1558 = vrcp.f32 %v629_v9 }
 0x3d3   : > { %v1559_v10 = vpop.eup %1558 }
 0x3d4   : > { %v631_v11 = vmul.f32 %v1559_v10, %v1555_v62 }
 0x3d6   : > { %v632_v12 = vpack.c.bf16 %v631_v11, %v631_v11 }
 0x3da   : > { %1328 = vmatmul.msk.bf16.vlgmr.msrb.gmra.mxu2 %vm561_vm6, %v632_v12 }
 0x44d   : > { %v592_v14 = vpop.f32.mrf.mxu2 }
 0x455   : > { %v594_v15 = vpop.f32.mrf.mxu2 }
 0x45d   : > { %v650_v16 = vpop.f32.mrf.mxu2 }
 0x45e   : > { %655 = vrot.lane.b32.xlu1 %v650_v16, %s1787_s24 }
 0x465   : > { %v652_v17 = vpop.f32.mrf.mxu2 }
 0x4d0   : > { %v656_v19 = vpop.permute.xlu1 %655 }
 0x4d1   : > { %v658_v20 = vsel %vm536_vm5, %v592_v14, %v656_v19  ;;  %v1448_v19 = vld [vmem:[%s2180_s3 + $0x18] sm:$0xff] }
 0x4d2   : > { %v659_v21 = vpack.c.bf16 %v658_v20, %v658_v20  ;;  %882 = vmatpush.bf16.msra.mxu2 %v1448_v19  ;;  %v1447_v20 = vld [vmem:[%s2180_s3 + $0x10] sm:$0xff] }
 0x4d4   : > { %1337 = vmatmul.msk.bf16.vlgmr.msrb.gmra.mxu0 %vm443_vm0, %v659_v21 }
 0x4d6   : > { %883 = vmatpush.bf16.msra.mxu2 %v1447_v20 }
 0x551   : > { %v685_v24 = vpop.f32.mrf.mxu0 }
 0x552   : > { %v686_v25 = vadd.f32 %v685_v24, %v660_v23 }
 0x554   : > { %v689_v26 = vadd.f32 %v686_v25, %v1982_v31  ;;  %v1441_v31 = vld [vmem:[%s2183_s6] sm:$0xff] }
 0x555   : > { %742 = vmatpush.bf16.msrb.mxu1 %v1441_v31 }
 0x556   : > { %v690_v27 = vsel %vm443_vm0, %v689_v26, 0.0 }
 0x557   : > { %691 = vadd.xlane.f32.xlu2 %v690_v27 }
 0x559   : > { %v687_v28 = vpop.f32.mrf.mxu0 }
 0x5ca   : > { %v692_v29 = vpop.xlane.xlu2 %691 }
 0x5cb   : > { %v693_v30 = vmul.f32 %v692_v29, %v1971_v8 }
 0x5cd   : > { %v694_v32 = vsub.f32 %v689_v26, %v693_v30 }
 0x5cf   : > { %v695_v33 = vmul.f32 %v694_v32, %v694_v32 }
 0x5d1   : > { %v696_v34 = vsel %vm443_vm0, %v695_v33, 0.0 }
 0x5d2   : > { %697 = vadd.xlane.f32.xlu1 %v696_v34  ;;  %v825_v34 = vperm.slane %v2025_v22, 5 }
 0x645   : > { %v698_v36 = vpop.xlane.xlu1 %697 }
 0x646   : > { %v699_v37 = vmul.f32 %v698_v36, %v1971_v8 }
 0x648   : > { %v700_v38 = vadd.f32 1e-05, %v699_v37 }
 0x64a   : > { %1560 = vrsqrt.f32 %v700_v38  ;;  %vm707_vm9 = vweird.f32 %v700_v38 }
 0x650   : > { %v1561_v39 = vpop.eup %1560 }
 0x651   : > { %v702_v40 = vmul.f32 %v1561_v39, %v700_v38  ;;  %vm708_vm8 = vweird.f32 %v1561_v39  ;;  %v1546_v38 = vld [vmem:[#allocation7 + $0x1] ss:$0 sm:$0xff] }
 0x652   : > { %vm709_vm10 = vmor %vm707_vm9, %vm708_vm8 }
 0x653   : > { %v703_v41 = vmul.f32 %v1561_v39, %v702_v40 }
 0x655   : > { %v704_v42 = vmul.f32 0.5, %v703_v41 }
 0x657   : > { %v705_v44 = vsub.f32 1.5, %v704_v42 }
 0x659   : > { %v706_v45 = vmul.f32 %v1561_v39, %v705_v44 }
 0x65b   : > { %v710_v47 = vsel %vm709_vm10, %v1561_v39, %v706_v45 }
 0x65c   : > { %v711_v48 = vmul.f32 %v710_v47, %v694_v32  ;;  %v823_v32 = vperm.slane %v2025_v22, 4 }
 0x65e   : > { %v713_v50 = vmul.f32 %v712_v46, %v711_v48 }
 0x660   : > { %v715_v51 = vadd.f32 %v714_v49, %v713_v50 }
 0x662   : > { %v716_v52 = vpack.c.bf16 %v715_v51, %v715_v51 }
 0x664   : > { %1346 = vmatmul.msk.bf16.vlgmr.msrb.gmra.mxu1 %vm443_vm0, %v716_v52 }
 0x6e1   : > { %v744_v58 = vpop.f32.mrf.mxu1 }
 0x6e2   : > { %v745_v59 = vadd.f32 %v1545_v57, %v744_v58 }
 0x6e4   : > { %v749_v60 = vmul.f32 0.044715, %v745_v59  ;;  %v748_v3 = vmul.f32 0.5, %v745_v59 }
 0x6e6   : > { %v750_v61 = vmul.f32 %v749_v60, %v745_v59 }
 0x6e8   : > { %v751_v62 = vmul.f32 %v750_v61, %v745_v59 }
 0x6e9   : > { %v746_v63 = vpop.f32.mrf.mxu1 }
 0x6ea   : > { %v752_v0 = vadd.f32 %v751_v62, %v745_v59 }
 0x6ec   : > { %v753_v1 = vmul.f32 0.7978846, %v752_v0 }
 0x6ee   : > { %1562 = vtanh.f32 %v753_v1 }
 0x6f4   : > { %v1563_v2 = vpop.eup %1562 }
 0x6f5   : > { %v755_v4 = vadd.f32 1.0, %v1563_v2 }
 0x6f7   : > { %v756_v5 = vmul.f32 %v755_v4, %v748_v3 }
 0x6f9   : > { %v757_v6 = vpack.c.bf16 %v756_v5, %v756_v5 }
 0x6fb   : > { %1363 = vmatmul.msk.bf16.vlgmr.msrb.gmra.mxu3 %vm783_vm11, %v757_v6 }
 0x77e   : > { %v796_v9 = vpop.f32.mrf.mxu3 }
 0x77f   : > { %v797_v10 = vadd.f32 %v796_v9, %v758_v7 }
 0x781   : > { %v800_v11 = vadd.f32 %v797_v10, %v715_v51 }
 0x783   : > { %v801_v12 = vsel %vm443_vm0, %v800_v11, 0.0 }
 0x784   : > { %802 = vadd.xlane.f32.xlu0 %v801_v12 }
 0x786   : > { %v798_v13 = vpop.f32.mrf.mxu3 }
 0x7f7   : > { %v803_v14 = vpop.xlane.xlu0 %802 }
 0x7f8   : > { %v804_v15 = vmul.f32 %v803_v14, %v1971_v8 }
 0x7fa   : > { %v805_v16 = vsub.f32 %v800_v11, %v804_v15 }
 0x7fc   : > { %v806_v17 = vmul.f32 %v805_v16, %v805_v16 }
 0x7fe   : > { %v807_v18 = vsel %vm443_vm0, %v806_v17, 0.0 }
 0x7ff   : > { %808 = vadd.xlane.f32.xlu0 %v807_v18 }
 0x872   : > { %v809_v21 = vpop.xlane.xlu0 %808 }
 0x873   : > { %v810_v23 = vmul.f32 %v809_v21, %v1971_v8  ;;  %v1449_v21 = vld [vmem:[%s2182_s5 + $0x10] sm:$0xff] }
 0x875   : > { %v811_v24 = vadd.f32 1e-05, %v810_v23 }
 0x877   : > { %1564 = vrsqrt.f32 %v811_v24  ;;  %vm818_vm13 = vweird.f32 %v811_v24 }
 0x87d   : > { %v1565_v25 = vpop.eup %1564 }
 0x87e   : > { %v813_v26 = vmul.f32 %v1565_v25, %v811_v24  ;;  %vm819_vm12 = vweird.f32 %v1565_v25 }
 0x87f   : > { %vm820_vm14 = vmor %vm818_vm13, %vm819_vm12 }
 0x880   : > { %v814_v27 = vmul.f32 %v1565_v25, %v813_v26  ;;  %v2104_v26 = vld [vmem:[%s2186_s9 + $0x8] sm:$0x3f] }
 0x882   : > { %v815_v28 = vmul.f32 0.5, %v814_v27  ;;  %v1011_v27 = vperm.slane %v2104_v26, 0 }
 0x884   : > { %v816_v29 = vsub.f32 1.5, %v815_v28 }
 0x886   : > { %v817_v30 = vmul.f32 %v1565_v25, %v816_v29 }
 0x888   : > { %v821_v33 = vsel %vm820_vm14, %v1565_v25, %v817_v30 }
 0x889   : > { %v822_v35 = vmul.f32 %v821_v33, %v805_v16  ;;  %v1450_v16 = vld [vmem:[%s2182_s5 + $0x18] sm:$0xff] }
 0x88b   : > { %v824_v31 = vmul.f32 %v823_v32, %v822_v35 }
 0x88d   : > { %v2068_v36 = vadd.f32 %v825_v34, %v824_v31 }
 0x88f   : > { %v857_v37 = vpack.c.bf16 %v2068_v36, %v2068_v36 }
 0x891   : > { %1393 = vmatmul.msk.bf16.vlgmr.msra.gmra.mxu2 %vm443_vm0, %v857_v37 }
 0x914   : > { %v885_v39 = vpop.f32.mrf.mxu2 }
 0x915   : > { %v886_v40 = vadd.f32 %v1546_v38, %v885_v39  ;;  %v1452_v39 = vld [vmem:[%s2183_s6 + $0x18] sm:$0xff] }
 0x917   : > { %v889_v41 = vpack.c.bf16 %v886_v40, %v886_v40 }
 0x919   : > { %947 = vrot.lane.b32.xlu2 %v889_v41, %s1782_s28  ;;  %949 = vrot.lane.b32.xlu0 %v889_v41, %s1784_s2  ;;  %s1720_s2 = scalar_lea.hbm %s2187_s10, 16 }
 0x91c   : > { %v887_v42 = vpop.f32.mrf.mxu2 }
 0x921   : > { %984 = vrot.lane.b32.xlu2 %v889_v41, %s1785_s25  ;;  %891 = vrot.lane.b32.xlu0 %v889_v41, %s1783_s26 }
 0x929   : > { %926 = vrot.lane.b32.xlu2 %v889_v41, %s1786_s7  ;;  %s1434_s7 = sshll.u32 %s1864_s17, 3  ;;  %s1179_s17 = scalar_lea.sflag [#allocation4], %s1952_s22 }
 0x92a   : > { %s1189_s4 = scalar_lea.hbm %s2187_s10, %s1434_s7 }
 0x92b   : > { %s1193_s18 = sshll.u32 %s1189_s4, 4  ;;  %s1194_s18 = int_to_ptr.hbm [resolvable:$true] %s1193_s18 }
 0x92c   : > { %s1714_s30 = sshra.s32 %s1194_s18, 4  ;;  %s1715_s30 = int_to_ptr.hbm [resolvable:$true] %s1714_s30 }
 0x92d   : > { %s1716_s21 = scalar_lea.hbm %s1715_s30, 8  ;;  %p1721_p10 = scmp.lt.s32.totalorder %s1715_s30, %s2187_s10 }
 0x92e   : > { %p1717_p4 = scmp.ne.s32.totalorder %s1715_s30, %s1716_s21  ;;  %p1722_p2 = scmp.lt.s32.totalorder %s1720_s2, %s1716_s21 }
 0x930   : > { %p1718_p8 = pnand %p1717_p4, %p1925_p3  ;;  %p1723_p11 = por %p1722_p2, %p1721_p10 }
 0x932   : > { %p1719_p9 = pneg %p1718_p8 }
 0x934   : > { %p1724_p12 = pnand %p1723_p11, %p1719_p9 }
 0x973   : > { %v948_v22 = vpop.permute.xlu2 %947 }
 0x97b   : > { %v985_v44 = vpop.permute.xlu2 %984 }
 0x97c   : > { %v990_v45 = vsel %vm579_vm7, %v985_v44, 0 }
 0x97d   : > { %999 = vmatpush.bf16.msrb.mxu2 %v990_v45 }
 0x983   : > { %v927_v46 = vpop.permute.xlu2 %926 }
 0x984   : > { %v932_v47 = vsel %vm579_vm7, %v927_v46, 0 }
 0x985   : > { %941 = vmatpush.bf16.msra.mxu1 %v932_v47 }
 0x989   : > { %1092 = vmatpush.bf16.msrb.mxu1 %v1452_v39 }
 0x98b   : > { %v950_v48 = vpop.permute.xlu0 %949 }
 0x98c   : > { %v955_v49 = vsel %vm536_vm5, %v950_v48, 0 }
 0x98d   : > { %964 = vmatpush.bf16.xpose.msra.mxu3 %v955_v49  ;;  %v1063_v49 = vperm.slane %v2104_v26, 1 }
 0x993   : > { %v892_v50 = vpop.permute.xlu0 %891 }
 0x994   : > { %v897_v51 = vsel %vm536_vm5, %v892_v50, 0  ;;  %1396 = vmatmul.msk.bf16.vlgmr.msra.gmra.mxu3 %vm536_vm5, %v948_v22 }
 0x995   : > { %906 = vmatpush.bf16.xpose.msra.mxu0 %v897_v51  ;;  %v1065_v51 = vperm.slane %v2104_v26, 2 }
 0x99c   : > { %1394 = vmatmul.msk.bf16.vlgmr.msra.gmra.mxu0 %vm536_vm5, %v889_v41 }
 0x99d   : > { %1033 = vmatpush.bf16.msrb.mxu0 %v1450_v16 }
 0x9a1   : > { %1034 = vmatpush.bf16.msrb.mxu0 %v1449_v21 }
 0xa17   : > { %v966_v52 = vpop.f32.mrf.mxu3 }
 0xa18   : > { %v970_v53 = vmul.f32 0.25, %v966_v52 }
 0xa19   : > { %v908_v54 = vpop.f32.mrf.mxu0 }
 0xa1a   : > { %v912_v55 = vmul.f32 0.25, %v908_v54  ;;  %v971_v56 = vadd.f32 %v1999_v43, %v970_v53 }
 0xa1c   : > { %v972_v57 = vsel %vm561_vm6, %v971_v56, -inf  ;;  %v913_v58 = vadd.f32 %v1999_v43, %v912_v55 }
 0xa1d   : > { %973 = vmax.xlane.f32.xlu1 %v972_v57  ;;  %v1455_v57 = vld [vmem:[%s2185_s8 + $0x30] sm:$0xff] }
 0xa1e   : > { %v914_v59 = vsel %vm561_vm6, %v913_v58, -inf }
 0xa1f   : > { %v968_v60 = vpop.f32.mrf.mxu3  ;;  %915 = vmax.xlane.f32.xlu0 %v914_v59  ;;  %v1453_v59 = vld [vmem:[%s2185_s8 + $0x20] sm:$0xff] }
 0xa20   : > { %v1547_v60 = vld [vmem:[#allocation8 + $0x1] ss:$0 sm:$0xff] }
 0xa21   : > { %v910_v61 = vpop.f32.mrf.mxu0 }
 0xa90   : > { %v974_v62 = vpop.xlane.xlu1 %973 }
 0xa91   : > { %v975_v63 = vsub.f32 %v971_v56, %v974_v62  ;;  %v1456_v56 = vld [vmem:[%s2185_s8 + $0x38] sm:$0xff] }
 0xa92   : > { %v916_v0 = vpop.xlane.xlu0 %915  ;;  %1141 = vmatpush.bf16.msrb.mxu3 %v1456_v56 }
 0xa93   : > { %v976_v1 = vmul.f32 1.442695, %v975_v63  ;;  %v917_v2 = vsub.f32 %v913_v58, %v916_v0  ;;  %v1454_v58 = vld [vmem:[%s2185_s8 + $0x28] sm:$0xff] }
 0xa95   : > { %1566 = vpow2.f32 %v976_v1  ;;  %v918_v3 = vmul.f32 1.442695, %v917_v2 }
 0xa96   : > { %1142 = vmatpush.bf16.msrb.mxu3 %v1455_v57 }
 0xa97   : > { %1568 = vpow2.f32 %v918_v3 }
 0xa9a   : > { %1143 = vmatpush.bf16.msrb.mxu3 %v1454_v58 }
 0xa9b   : > { %v1567_v4 = vpop.eup %1566 }
 0xa9c   : > { %v978_v5 = vsel %vm561_vm6, %v1567_v4, 0.0 }
 0xa9d   : > { %979 = vadd.xlane.f32.xlu1 %v978_v5  ;;  %v1569_v6 = vpop.eup %1568 }
 0xa9e   : > { %v920_v43 = vsel %vm561_vm6, %v1569_v6, 0.0  ;;  %1144 = vmatpush.bf16.msrb.mxu3 %v1453_v59 }
 0xaa5   : > { %921 = vadd.xlane.f32.xlu1 %v920_v43 }
 0xb10   : > { %v980_v7 = vpop.xlane.xlu1 %979 }
 0xb11   : > { %1570 = vrcp.f32 %v980_v7 }
 0xb17   : > { %v1571_v9 = vpop.eup %1570 }
 0xb18   : > { %v982_v10 = vmul.f32 %v1571_v9, %v1567_v4  ;;  %v922_v11 = vpop.xlane.xlu1 %921 }
 0xb19   : > { %1572 = vrcp.f32 %v922_v11 }
 0xb1a   : > { %v983_v12 = vpack.c.bf16 %v982_v10, %v982_v10  ;;  %v1109_v10 = vperm.slane %v2104_v26, 3 }
 0xb1c   : > { %1397 = vmatmul.msk.bf16.vlgmr.msrb.gmra.mxu2 %vm561_vm6, %v983_v12 }
 0xb1f   : > { %v1573_v13 = vpop.eup %1572 }
 0xb20   : > { %v924_v14 = vmul.f32 %v1573_v13, %v1569_v6 }
 0xb22   : > { %v925_v15 = vpack.c.bf16 %v924_v14, %v924_v14 }
 0xb24   : > { %1395 = vmatmul.msk.bf16.vlgmr.msra.gmra.mxu1 %vm561_vm6, %v925_v15 }
 0xb9f   : > { %v1001_v17 = vpop.f32.mrf.mxu2 }
 0xba0   : > { %1006 = vrot.lane.b32.xlu1 %v1001_v17, %s1787_s24 }
 0xba1   : > { %v943_v18 = vpop.f32.mrf.mxu1 }
 0xba7   : > { %v1003_v19 = vpop.f32.mrf.mxu2 }
 0xba9   : > { %v945_v20 = vpop.f32.mrf.mxu1 }
 0xc12   : > { %v1007_v23 = vpop.permute.xlu1 %1006 }
 0xc13   : > { %v1009_v24 = vsel %vm536_vm5, %v943_v18, %v1007_v23 }
 0xc14   : > { %v1010_v25 = vpack.c.bf16 %v1009_v24, %v1009_v24 }
 0xc16   : > { %1406 = vmatmul.msk.bf16.vlgmr.msrb.gmra.mxu0 %vm443_vm0, %v1010_v25 }
 0xc93   : > { %v1036_v28 = vpop.f32.mrf.mxu0 }
 0xc94   : > { %v1037_v29 = vadd.f32 %v1036_v28, %v1011_v27 }
 0xc96   : > { %v1040_v30 = vadd.f32 %v1037_v29, %v2068_v36  ;;  %v1451_v36 = vld [vmem:[%s2183_s6 + $0x10] sm:$0xff] }
 0xc97   : > { %1093 = vmatpush.bf16.msrb.mxu1 %v1451_v36 }
 0xc98   : > { %v1041_v32 = vsel %vm443_vm0, %v1040_v30, 0.0 }
 0xc99   : > { %1042 = vadd.xlane.f32.xlu2 %v1041_v32 }
 0xc9b   : > { %v1038_v33 = vpop.f32.mrf.mxu0 }
 0xc9c   : > { %v1173_v33 = vperm.slane %v2104_v26, 4 }
 0xd0c   : > { %v1043_v34 = vpop.xlane.xlu2 %1042 }
 0xd0d   : > { %v1044_v35 = vmul.f32 %v1043_v34, %v1971_v8 }
 0xd0f   : > { %v1045_v31 = vsub.f32 %v1040_v30, %v1044_v35  ;;  %v1175_v35 = vperm.slane %v2104_v26, 5 }
 0xd11   : > { %v1046_v37 = vmul.f32 %v1045_v31, %v1045_v31 }
 0xd13   : > { %v1047_v38 = vsel %vm443_vm0, %v1046_v37, 0.0 }
 0xd14   : > { %1048 = vadd.xlane.f32.xlu0 %v1047_v38 }
 0xd87   : > { %v1049_v40 = vpop.xlane.xlu0 %1048 }
 0xd88   : > { %v1050_v41 = vmul.f32 %v1049_v40, %v1971_v8 }
 0xd8a   : > { %v1051_v42 = vadd.f32 1e-05, %v1050_v41 }
 0xd8c   : > { %1574 = vrsqrt.f32 %v1051_v42  ;;  %vm1058_vm1 = vweird.f32 %v1051_v42 }
 0xd92   : > { %v1575_v22 = vpop.eup %1574 }
 0xd93   : > { %v1053_v44 = vmul.f32 %v1575_v22, %v1051_v42  ;;  %vm1059_vm15 = vweird.f32 %v1575_v22 }
 0xd94   : > { %vm1060_vm2 = vmor %vm1058_vm1, %vm1059_vm15 }
 0xd95   : > { %v1054_v45 = vmul.f32 %v1575_v22, %v1053_v44 }
 0xd97   : > { %v1055_v46 = vmul.f32 0.5, %v1054_v45 }
 0xd99   : > { %v1056_v47 = vsub.f32 1.5, %v1055_v46 }
 0xd9b   : > { %v1057_v48 = vmul.f32 %v1575_v22, %v1056_v47 }
 0xd9d   : > { %v1061_v50 = vsel %vm1060_vm2, %v1575_v22, %v1057_v48 }
 0xd9e   : > { %v1062_v52 = vmul.f32 %v1061_v50, %v1045_v31 }
 0xda0   : > { %v1064_v53 = vmul.f32 %v1063_v49, %v1062_v52 }
 0xda2   : > { %v1066_v54 = vadd.f32 %v1065_v51, %v1064_v53 }
 0xda4   : > { %v1067_v55 = vpack.c.bf16 %v1066_v54, %v1066_v54 }
 0xda6   : > { %1415 = vmatmul.msk.bf16.vlgmr.msrb.gmra.mxu1 %vm443_vm0, %v1067_v55 }
 0xe23   : > { %v1095_v61 = vpop.f32.mrf.mxu1 }
 0xe24   : > { %v1096_v62 = vadd.f32 %v1547_v60, %v1095_v61 }
 0xe26   : > { %v1100_v63 = vmul.f32 0.044715, %v1096_v62  ;;  %v1099_v6 = vmul.f32 0.5, %v1096_v62 }
 0xe28   : > { %v1101_v0 = vmul.f32 %v1100_v63, %v1096_v62 }
 0xe2a   : > { %v1102_v1 = vmul.f32 %v1101_v0, %v1096_v62 }
 0xe2b   : > { %v1097_v2 = vpop.f32.mrf.mxu1 }
 0xe2c   : > { %v1103_v3 = vadd.f32 %v1102_v1, %v1096_v62 }
 0xe2e   : > { %v1104_v4 = vmul.f32 0.7978846, %v1103_v3 }
 0xe30   : > { %1576 = vtanh.f32 %v1104_v4 }
 0xe36   : > { %v1577_v5 = vpop.eup %1576 }
 0xe37   : > { %v1106_v43 = vadd.f32 1.0, %v1577_v5 }
 0xe39   : > { %v1107_v7 = vmul.f32 %v1106_v43, %v1099_v6 }
 0xe3b   : > { %v1108_v9 = vpack.c.bf16 %v1107_v7, %v1107_v7 }
 0xe3d   : > { %1432 = vmatmul.msk.bf16.vlgmr.msrb.gmra.mxu3 %vm783_vm11, %v1108_v9 }
 0xec0   : > { %v1146_v11 = vpop.f32.mrf.mxu3 }
 0xec1   : > { %v1147_v12 = vadd.f32 %v1146_v11, %v1109_v10 }
 0xec3   : > { %v1150_v13 = vadd.f32 %v1147_v12, %v1066_v54 }
 0xec5   : > { %v1151_v14 = vsel %vm443_vm0, %v1150_v13, 0.0 }
 0xec6   : > { %1152 = vadd.xlane.f32.xlu1 %v1151_v14 }
 0xec8   : > { %v1148_v15 = vpop.f32.mrf.mxu3 }
 0xf39   : > { %v1153_v16 = vpop.xlane.xlu1 %1152 }
 0xf3a   : > { %v1154_v17 = vmul.f32 %v1153_v16, %v1971_v8 }
 0xf3c   : > { %v1155_v18 = vsub.f32 %v1150_v13, %v1154_v17 }
 0xf3e   : > { %v1156_v19 = vmul.f32 %v1155_v18, %v1155_v18 }
 0xf40   : > { %v1157_v20 = vsel %vm443_vm0, %v1156_v19, 0.0 }
 0xf41   : > { %1158 = vadd.xlane.f32.xlu0 %v1157_v20 }
 0xfb4   : > { %v1159_v21 = vpop.xlane.xlu0 %1158 }
 0xfb5   : > { %v1160_v23 = vmul.f32 %v1159_v21, %v1971_v8 }
 0xfb7   : > { %v1161_v24 = vadd.f32 1e-05, %v1160_v23 }
 0xfb9   : > { %1578 = vrsqrt.f32 %v1161_v24  ;;  %vm1168_vm4 = vweird.f32 %v1161_v24 }
 0xfbf   : > { %v1579_v25 = vpop.eup %1578 }
 0xfc0   : > { %v1163_v27 = vmul.f32 %v1579_v25, %v1161_v24  ;;  %vm1169_vm3 = vweird.f32 %v1579_v25 }
 0xfc1   : > { %vm1170_vm5 = vmor %vm1168_vm4, %vm1169_vm3 }
 0xfc2   : > { %v1164_v28 = vmul.f32 %v1579_v25, %v1163_v27 }
 0xfc4   : > { %v1165_v29 = vmul.f32 0.5, %v1164_v28 }
 0xfc6   : > { %v1166_v30 = vsub.f32 1.5, %v1165_v29 }
 0xfc8   : > { %v1167_v32 = vmul.f32 %v1579_v25, %v1166_v30 }
 0xfca   : > { %v1171_v8 = vsel %vm1170_vm5, %v1579_v25, %v1167_v32 }
 0xfcb   : > { %v1172_v34 = vmul.f32 %v1171_v8, %v1155_v18 }
 0xfcd   : > { %v1174_v31 = vmul.f32 %v1173_v33, %v1172_v34 }
 0xfcf   : > { %v1176_v37 = vadd.f32 %v1175_v35, %v1174_v31 }
 0xfd1   : > { %1177 = vst.msk [vmem:[%s435_s29] sm:$0xff] %vm443_vm0, %v1176_v37 }
 0xfd2   : > { %1727 = shalt.err (!%p1724_p12)
}
 0xfd3   : > { %1471 = dma.vmem_to_hbm [thread:$0]  (%p1925_p3), %s1192_s11, 128, %s1194_s18, %s1179_s17  }
 0xfd4 PF: > { %s1205_s22 = sand.u32 1, %s1762_s13   ;;  %p2203_p13 = scmp.ge.s32.totalorder %s1774_s16, 2 }
 0xfd5   : > { %s1206_s27 = scalar_lea.sflag [#allocation4], %s1205_s22 }
 0xfd6   : > { %p1488_p0 = pnand %p2203_p13, %p1878_p6 }
 0xfd8   : > { %p1489_p5 = pneg %p1488_p0 }
 0xfda   : > { %1757 = dma.done.wait (%p1489_p5), %s1206_s27, 128  }
 0xfdb   : > { %1759 = vsyncadd (%p1489_p5), %s1206_s27, 4294967168  ;;  %s2204_s24 = sld [smem:[#allocation15_spill]]  ;;  %p25_p7 = scmp.ge.s32.totalorder %s1912_s23, 4  }
 0xfdc   : > { %s2205_s13 = smov %s1766_s14  ;;  %s2206_s14 = smov %s1770_s15 }
 0xfdd   : > { %s2208_s16 = smov %s1912_s23  ;;  %27 = sbr.rel (!%p25_p7) target bundleno = 11 (0xb), region = 127 }
 0xfe1   : > { %s2207_s15 = smov %s2204_s24 }
 0xfe2   :  { %1212 = vsyncpa [#allocation3], 1 }
 0xfe3   :  { %1214 = vsyncpa [#allocation3 + $0x1], 1 }
 0xfe4   :  { %1215 = vsyncpa [#allocation6], 1 }
 0xfe5   :  { %1216 = vsyncpa [#allocation9], 1 }
 0xfe6   :  { %1217 = vsyncpa [#allocation4], 1 }
 0xfe7   :  { %1219 = vsyncpa [#allocation4 + $0x1], 1 }

</bundles_post_ra>
